<compile_context>
chip_gen: v6e
topology: v6e:2x2x1
jax: 0.10.0
libtpu: 0.0.40
codegen_flags: <defaults>
</compile_context>

<pallas_src>
import jax
import jax.numpy as jnp
from jax import lax
from jax.experimental import pallas as pl
from jax.experimental.pallas import tpu as pltpu


def mlp_kernel(x_ref, w1_ref, b1_ref, w2_ref, b2_ref, w3_ref, b3_ref, o_ref):
    # x arrives in its HBM dtype (typically f32); cast to bf16 on the VPU so the
    # dominant activation stream is a single HBM read (no wrapper-side cast).
    x = x_ref[...].astype(jnp.bfloat16)

    # Layer 1: (tb,1024)bf16 @ (1024,256)bf16 -> f32 accum, + b1, ReLU.
    h1 = jnp.dot(x, w1_ref[...], preferred_element_type=jnp.float32)
    h1 = jnp.maximum(h1 + b1_ref[...], 0.0)
    # Dropout(0.5): identity at inference time.

    # Layer 2: (tb,256)bf16 @ (256,128)bf16 -> f32 accum, + b2, ReLU.
    h2 = jnp.dot(h1.astype(jnp.bfloat16), w2_ref[...],
                 preferred_element_type=jnp.float32)
    h2 = jnp.maximum(h2 + b2_ref[...], 0.0)
    # Dropout(0.5): identity at inference time.

    # Layer 3: contract the (1,128) bf16 weight row with h2's feature dim so the
    # result is lane-dense (1, tb) -- a full-lane vst instead of a width-1
    # masked store.  bf16 operands keep the transpose/MXU path cheap.
    row = lax.dot_general(
        w3_ref[...], h2.astype(jnp.bfloat16),
        dimension_numbers=(((1,), (1,)), ((), ())),
        preferred_element_type=jnp.float32)
    o_ref[0] = row + b3_ref[0]          # b3 is a scalar living in SMEM


def _round_up(x, m):
    return ((x + m - 1) // m) * m


def mlp_forward(x_nchw, params, *, tb=1024):
    """x_nchw: (B, C, H, W) with C*H*W == 1024.  Returns (B, 1) float32."""
    B = x_nchw.shape[0]
    x = x_nchw.reshape(B, -1)            # row-major flatten, like x.view(B, -1)
    assert x.shape[1] == 1024, "flattened feature dim must be 1024"

    # Batch tile: lane-dense (>=128, 128-aligned).  For B > 128 the tile is
    # capped so the grid has at least 2 steps -> both v7x TensorCores get work.
    tb = max(128, _round_up(tb, 128))
    if B <= 128:
        tb_eff = 128
    else:
        tb_eff = min(tb, _round_up(pl.cdiv(B, 2), 128))
    n_tiles = pl.cdiv(B, tb_eff)
    b_pad = n_tiles * tb_eff

    # Only pad ragged batches; x keeps its HBM dtype (bf16 cast is in-kernel).
    if b_pad != B:
        x = jnp.pad(x, ((0, b_pad - B), (0, 0)))

    w1, b1, w2, b2, w3, b3 = params
    w1 = w1.astype(jnp.bfloat16)                       # (1024, 256)
    w2 = w2.astype(jnp.bfloat16)                       # (256, 128)
    b1 = b1.reshape(1, 256).astype(jnp.float32)
    b2 = b2.reshape(1, 128).astype(jnp.float32)
    w3_row = w3.reshape(1, 128).astype(jnp.bfloat16)   # (128,1) column -> (1,128) row
    b3_s = b3.reshape(1).astype(jnp.float32)           # scalar, placed in SMEM

    single = pl.Buffered(1)   # grid-invariant blocks: no double-buffer VMEM cost

    out = pl.pallas_call(
        mlp_kernel,
        out_shape=jax.ShapeDtypeStruct((n_tiles, 1, tb_eff), jnp.float32),
        grid_spec=pltpu.PrefetchScalarGridSpec(
            num_scalar_prefetch=0,
            grid=(n_tiles,),
            in_specs=[
                pl.BlockSpec((tb_eff, 1024), lambda i: (i, 0)),       # x tile
                pl.BlockSpec((1024, 256), lambda i: (0, 0),
                             pipeline_mode=single),                   # W1 (bf16)
                pl.BlockSpec((1, 256), lambda i: (0, 0),
                             pipeline_mode=single),                   # b1 (f32)
                pl.BlockSpec((256, 128), lambda i: (0, 0),
                             pipeline_mode=single),                   # W2 (bf16)
                pl.BlockSpec((1, 128), lambda i: (0, 0),
                             pipeline_mode=single),                   # b2 (f32)
                pl.BlockSpec((1, 128), lambda i: (0, 0),
                             pipeline_mode=single),                   # W3 row (bf16)
                pl.BlockSpec(memory_space=pltpu.MemorySpace.SMEM),    # b3 scalar
            ],
            out_specs=pl.BlockSpec((1, 1, tb_eff), lambda i: (i, 0, 0)),
        ),
        compiler_params=pltpu.CompilerParams(
            dimension_semantics=("parallel",),      # megacore-shardable on v7x
            vmem_limit_bytes=32 * 1024 * 1024,
        ),
    )(x, w1, b1, w2, b2, w3_row, b3_s)

    # Lane-dense kernel output (n_tiles, 1, tb) -> (B, 1); drop padded rows.
    return out.reshape(-1)[:B].reshape(B, 1)


def init_params(key):
    """Deterministic init mimicking nn.Linear's U(-1/sqrt(fan_in), 1/sqrt(fan_in))."""
    ks = jax.random.split(key, 6)

    def linear(kw, kb, fan_in, fan_out):
        bound = 1.0 / jnp.sqrt(fan_in)
        w = jax.random.uniform(kw, (fan_in, fan_out), jnp.float32, -bound, bound)
        b = jax.random.uniform(kb, (1, fan_out), jnp.float32, -bound, bound)
        return w, b

    w1, b1 = linear(ks[0], ks[1], 1024, 256)
    w2, b2 = linear(ks[2], ks[3], 256, 128)
    w3, b3 = linear(ks[4], ks[5], 128, 1)
    return (w1, b1, w2, b2, w3, b3)


if __name__ == "__main__":
    key = jax.random.PRNGKey(0)
    k_x, k_p = jax.random.split(key)

    # Small NCHW input whose flattened feature dim is 1024: (2, 4, 16, 16).
    x = jax.random.normal(k_x, (2, 4, 16, 16), dtype=jnp.float32)
    params = init_params(k_p)

    out = jax.block_until_ready(mlp_forward(x, params))

    # Pure-JAX reference on the same bf16-matmul / f32-accumulate path.
    w1, b1, w2, b2, w3, b3 = params
    xf = x.reshape(x.shape[0], -1).astype(jnp.bfloat16)
    h1 = jnp.maximum(
        jnp.dot(xf, w1.astype(jnp.bfloat16),
                preferred_element_type=jnp.float32) + b1, 0.0)
    h2 = jnp.maximum(
        jnp.dot(h1.astype(jnp.bfloat16), w2.astype(jnp.bfloat16),
                preferred_element_type=jnp.float32) + b2, 0.0)
    ref = jnp.dot(h2.astype(jnp.bfloat16), w3.astype(jnp.bfloat16),
                  preferred_element_type=jnp.float32) + b3

    assert out.shape == (2, 1), out.shape
    assert jnp.allclose(out, ref, atol=2e-2, rtol=2e-2), (out, ref)

    print("KERNEL_OK")
</pallas_src>

<mosaic_0001>
module attributes {stable_mosaic.version = 11 : i64} {
  func.func @mlp_kernel(%arg0: i32, %arg1: memref<128x1024xf32, #tpu.memory_space<vmem>>, %arg2: memref<1024x256xbf16, #tpu.memory_space<vmem>>, %arg3: memref<1x256xf32, #tpu.memory_space<vmem>>, %arg4: memref<256x128xbf16, #tpu.memory_space<vmem>>, %arg5: memref<1x128xf32, #tpu.memory_space<vmem>>, %arg6: memref<1x128xbf16, #tpu.memory_space<vmem>>, %arg7: memref<1xf32, #tpu.memory_space<smem>>, %arg8: memref<1x1x128xf32, #tpu.memory_space<vmem>>) attributes {dimension_semantics = [#tpu.dimension_semantics<parallel>], iteration_bounds = array<i64: 1>, scalar_prefetch = 0 : i64, scratch_operands = 0 : i64, tpu.core_type = #tpu.core_type<tc>, window_params = [{transform_indices = @transform_0, window_bounds = array<i64: 128, 1024>}, {pipeline_mode = #tpu.pipeline_mode<synchronous>, transform_indices = @transform_1, window_bounds = array<i64: 1024, 256>}, {pipeline_mode = #tpu.pipeline_mode<synchronous>, transform_indices = @transform_2, window_bounds = array<i64: 1, 256>}, {pipeline_mode = #tpu.pipeline_mode<synchronous>, transform_indices = @transform_3, window_bounds = array<i64: 256, 128>}, {pipeline_mode = #tpu.pipeline_mode<synchronous>, transform_indices = @transform_4, window_bounds = array<i64: 1, 128>}, {pipeline_mode = #tpu.pipeline_mode<synchronous>, transform_indices = @transform_5, window_bounds = array<i64: 1, 128>}, {transform_indices = @transform_6, window_bounds = array<i64: 1>}, {transform_indices = @transform_7, window_bounds = array<i64: 1, 1, 128>}]} {
    %c0 = arith.constant 0 : index
    %c0_0 = arith.constant 0 : index
    %0 = vector.load %arg1[%c0, %c0_0] : memref<128x1024xf32, #tpu.memory_space<vmem>>, vector<128x1024xf32>
    %1 = arith.truncf %0 : vector<128x1024xf32> to vector<128x1024xbf16>
    %c0_1 = arith.constant 0 : index
    %c0_2 = arith.constant 0 : index
    %2 = vector.load %arg2[%c0_1, %c0_2] : memref<1024x256xbf16, #tpu.memory_space<vmem>>, vector<1024x256xbf16>
    %cst = arith.constant dense<0.000000e+00> : vector<128x256xf32>
    %3 = tpu.matmul %1, %2, %cst {dimension_numbers = #tpu.dot_dimension_numbers<[1], [0], [0], [1], [0, 0, 1, 1], [], []>} : vector<128x1024xbf16>, vector<1024x256xbf16>, vector<128x256xf32> -> vector<128x256xf32>
    %c0_3 = arith.constant 0 : index
    %c0_4 = arith.constant 0 : index
    %4 = vector.load %arg3[%c0_3, %c0_4] : memref<1x256xf32, #tpu.memory_space<vmem>>, vector<1x256xf32>
    %5 = vector.broadcast %4 : vector<1x256xf32> to vector<128x256xf32>
    %6 = arith.addf %3, %5 : vector<128x256xf32>
    %cst_5 = arith.constant 0.000000e+00 : f32
    %7 = vector.broadcast %cst_5 : f32 to vector<128x256xf32>
    %8 = arith.maximumf %6, %7 : vector<128x256xf32>
    %9 = arith.truncf %8 : vector<128x256xf32> to vector<128x256xbf16>
    %c0_6 = arith.constant 0 : index
    %c0_7 = arith.constant 0 : index
    %10 = vector.load %arg4[%c0_6, %c0_7] : memref<256x128xbf16, #tpu.memory_space<vmem>>, vector<256x128xbf16>
    %cst_8 = arith.constant dense<0.000000e+00> : vector<128x128xf32>
    %11 = tpu.matmul %9, %10, %cst_8 {dimension_numbers = #tpu.dot_dimension_numbers<[1], [0], [0], [1], [0, 0, 1, 1], [], []>} : vector<128x256xbf16>, vector<256x128xbf16>, vector<128x128xf32> -> vector<128x128xf32>
    %c0_9 = arith.constant 0 : index
    %c0_10 = arith.constant 0 : index
    %12 = vector.load %arg5[%c0_9, %c0_10] : memref<1x128xf32, #tpu.memory_space<vmem>>, vector<1x128xf32>
    %13 = vector.broadcast %12 : vector<1x128xf32> to vector<128x128xf32>
    %14 = arith.addf %11, %13 : vector<128x128xf32>
    %cst_11 = arith.constant 0.000000e+00 : f32
    %15 = vector.broadcast %cst_11 : f32 to vector<128x128xf32>
    %16 = arith.maximumf %14, %15 : vector<128x128xf32>
    %c0_12 = arith.constant 0 : index
    %c0_13 = arith.constant 0 : index
    %17 = vector.load %arg6[%c0_12, %c0_13] : memref<1x128xbf16, #tpu.memory_space<vmem>>, vector<1x128xbf16>
    %18 = arith.truncf %16 : vector<128x128xf32> to vector<128x128xbf16>
    %cst_14 = arith.constant dense<0.000000e+00> : vector<1x128xf32>
    %19 = tpu.matmul %17, %18, %cst_14 {dimension_numbers = #tpu.dot_dimension_numbers<[1], [1], [0], [0], [0, 0, 1, 0], [], []>} : vector<1x128xbf16>, vector<128x128xbf16>, vector<1x128xf32> -> vector<1x128xf32>
    %c0_15 = arith.constant 0 : index
    %20 = memref.load %arg7[%c0_15] : memref<1xf32, #tpu.memory_space<smem>>
    %21 = vector.broadcast %20 : f32 to vector<1x128xf32>
    %22 = arith.addf %19, %21 : vector<1x128xf32>
    %c0_16 = arith.constant 0 : index
    %c0_17 = arith.constant 0 : index
    %c0_18 = arith.constant 0 : index
    %23 = vector.load %arg8[%c0_16, %c0_17, %c0_18] : memref<1x1x128xf32, #tpu.memory_space<vmem>>, vector<1x1x128xf32>
    %24 = vector.shape_cast %23 : vector<1x1x128xf32> to vector<1x128xf32>
    %25 = vector.shape_cast %22 : vector<1x128xf32> to vector<1x1x128xf32>
    tpu.vector_store %arg8[%c0_16, %c0_17, %c0_18], %25 {strides = array<i32>} : memref<1x1x128xf32, #tpu.memory_space<vmem>>, vector<1x1x128xf32>,
    return
  }
  func.func @transform_0(%arg0: i32) -> (i32, i32) {
    %c0_i32 = arith.constant 0 : i32
    %c0_i32_0 = arith.constant 0 : i32
    return %arg0, %c0_i32 : i32, i32
  }
  func.func @transform_1(%arg0: i32) -> (i32, i32) {
    %c0_i32 = arith.constant 0 : i32
    %c0_i32_0 = arith.constant 0 : i32
    %c0_i32_1 = arith.constant 0 : i32
    return %c0_i32, %c0_i32_0 : i32, i32
  }
  func.func @transform_2(%arg0: i32) -> (i32, i32) {
    %c0_i32 = arith.constant 0 : i32
    %c0_i32_0 = arith.constant 0 : i32
    %c0_i32_1 = arith.constant 0 : i32
    return %c0_i32, %c0_i32_0 : i32, i32
  }
  func.func @transform_3(%arg0: i32) -> (i32, i32) {
    %c0_i32 = arith.constant 0 : i32
    %c0_i32_0 = arith.constant 0 : i32
    %c0_i32_1 = arith.constant 0 : i32
    return %c0_i32, %c0_i32_0 : i32, i32
  }
  func.func @transform_4(%arg0: i32) -> (i32, i32) {
    %c0_i32 = arith.constant 0 : i32
    %c0_i32_0 = arith.constant 0 : i32
    %c0_i32_1 = arith.constant 0 : i32
    return %c0_i32, %c0_i32_0 : i32, i32
  }
  func.func @transform_5(%arg0: i32) -> (i32, i32) {
    %c0_i32 = arith.constant 0 : i32
    %c0_i32_0 = arith.constant 0 : i32
    %c0_i32_1 = arith.constant 0 : i32
    return %c0_i32, %c0_i32_0 : i32, i32
  }
  func.func @transform_6(%arg0: i32) -> i32 {
    %c0_i32 = arith.constant 0 : i32
    %c0_i32_0 = arith.constant 0 : i32
    return %c0_i32 : i32
  }
  func.func @transform_7(%arg0: i32) -> (i32, i32, i32) {
    %c0_i32 = arith.constant 0 : i32
    %c0_i32_0 = arith.constant 0 : i32
    %c0_i32_1 = arith.constant 0 : i32
    return %arg0, %c0_i32, %c0_i32_0 : i32, i32, i32
  }
}

</mosaic_0001>

<bundles_post_ra>
// kernel: tpu_custom_call.1
= control target key start
LH: loop header
LB: loop body
LE: loop exit
PB: predicated region body
PF: predicated region fallthrough
CT: control target
= control target key end

     0   :  { %13 = vsyncpa [#allocation4], 0  ;;  %s2689_s0 = inlined_call_operand.hbm [shape: f32[128,1024], index: 0, kind: input, shape index: {}]   ;;  %s2690_s1 = inlined_call_operand.hbm [shape: bf16[1024,256], index: 1, kind: input, shape index: {}]   ;;  %s2691_s2 = inlined_call_operand.vmem [shape: f32[1,256], index: 2, kind: input, shape index: {}]   ;;  %s2692_s3 = inlined_call_operand.hbm [shape: bf16[256,128], index: 3, kind: input, shape index: {}]   ;;  %s2693_s4 = inlined_call_operand.vmem [shape: f32[1,128], index: 4, kind: input, shape index: {}]   ;;  %s2694_s5 = inlined_call_operand.vmem [shape: bf16[1,128], index: 5, kind: input, shape index: {}]   ;;  %s2695_s6 = inlined_call_operand.<no memory space> [shape: f32[1], index: 6, kind: input, shape index: {}]   ;;  %s2696_s7 = inlined_call_operand.hbm [shape: f32[1,1,128], index: 7, kind: output, shape index: {}]  }
   0x1   :  { %14 = vsyncpa [#allocation7], 0 }
   0x2   :  { %15 = vsyncpa [#allocation5], 0  ;;  %s2401_s24 = smov [#allocation6]  }
   0x3   :  { %s33_s25 = sshll.u32 %s2401_s24, 4  ;;  %s34_s25 = int_to_ptr.vmem [resolvable:$true] %s33_s25 }
   0x4   :  { %s2323_s26 = scalar_lea.vmem %s34_s25, 16384  ;;  %p2328_p1 = scmp.lt.s32.totalorder %s34_s25, %s34_s25 }
   0x5   :  { %p2324_p0 = scmp.ne.s32.totalorder %s34_s25, %s2323_s26  ;;  %p2329_p2 = scmp.lt.s32.totalorder %s2323_s26, %s2323_s26 }
   0x7   :  { %p2330_p3 = por %p2329_p2, %p2328_p1 }
   0x9   :  { %p2331_p4 = pnand %p2330_p3, %p2324_p0 }
   0xb   :  { %2334 = shalt.err (!%p2331_p4)
}
   0xc   :  { %s2402_s27 = smov 128   ;;  %s2403_s28 = smov 8  }
   0xd   :  { %39 = dma.hbm_to_vmem [thread:$0]  %s2690_s1, 16384, %s34_s25, [#allocation7], %s2402_s27, %s2402_s27, %s2403_s28  }
   0xe   :  { %s2404_s8 = smov [#allocation3]  }
   0xf   :  { %s21_s9 = sshll.u32 %s2404_s8, 4  ;;  %s22_s9 = int_to_ptr.vmem [resolvable:$true] %s21_s9 }
  0x10   :  { %s2343_s10 = scalar_lea.vmem %s22_s9, 16384  ;;  %p2348_p6 = scmp.lt.s32.totalorder %s22_s9, %s22_s9 }
  0x11   :  { %p2344_p5 = scmp.ne.s32.totalorder %s22_s9, %s2343_s10  ;;  %p2349_p7 = scmp.lt.s32.totalorder %s2343_s10, %s2343_s10 }
  0x13   :  { %p2350_p8 = por %p2349_p7, %p2348_p6 }
  0x15   :  { %p2351_p9 = pnand %p2350_p8, %p2344_p5 }
  0x17   :  { %2354 = shalt.err (!%p2351_p9)
}
  0x18   :  { %s2405_s11 = smov 1024   ;;  %s2406_s12 = smov 64  }
  0x19   :  { %27 = dma.hbm_to_vmem [thread:$0]  %s2689_s0, 16384, %s22_s9, [#allocation4], %s2405_s11, %s2405_s11, %s2406_s12  }
  0x1a   :  { %s2407_s15 = smov [#allocation8]  }
  0x1b   :  { %s47_s16 = sshll.u32 %s2407_s15, 4  ;;  %s48_s16 = int_to_ptr.vmem [resolvable:$true] %s47_s16 }
  0x1c   :  { %s2363_s1 = scalar_lea.vmem %s48_s16, 2048  ;;  %p2368_p11 = scmp.lt.s32.totalorder %s48_s16, %s48_s16 }
  0x1d   :  { %p2364_p10 = scmp.ne.s32.totalorder %s48_s16, %s2363_s1  ;;  %p2369_p12 = scmp.lt.s32.totalorder %s2363_s1, %s2363_s1 }
  0x1f   :  { %p2370_p13 = por %p2369_p12, %p2368_p11 }
  0x21   :  { %p2371_p0 = pnand %p2370_p13, %p2364_p10 }
  0x23   :  { %2374 = shalt.err (!%p2371_p0)
}
  0x24   :  { %s2408_s17 = smov 4  }
  0x25   :  { %53 = dma.hbm_to_vmem [thread:$0]  %s2692_s3, 2048, %s48_s16, [#allocation7], %s2406_s12, %s2406_s12, %s2408_s17  }
  0x26   :  { %2395 = dma.done.wait [#allocation4], 16384  }
  0x27   :  { %2396 = vsyncadd [#allocation4], 4294950912 }
  0x28   :  { %2397 = dma.done.wait [#allocation7], 18432  }
  0x29   :  { %2398 = vsyncadd [#allocation7], 4294948864  ;;  %v2107_v0 = vld [vmem:[#allocation6 + $0x74] ss:$8 sps:$4 sm:$0xff]   ;;  %v2111_v2 = vld [vmem:[#allocation6 + $0x70] ss:$8 sps:$4 sm:$0xff]  }
  0x2a   :  { %v2109_v1 = vld [vmem:[#allocation6 + $0x174] ss:$8 sps:$4 sm:$0xff]   ;;  %1042 = vmatprep.subr.bf16.mxu0 %v2107_v0  ;;  %v2112_v3 = vld [vmem:[#allocation6 + $0x170] ss:$8 sps:$4 sm:$0xff]   ;;  %v2113_v4 = vld [vmem:[#allocation6 + $0x64] ss:$8 sps:$4 sm:$0xff]  }
  0x2b   :  { %1155 = vmatprep.subr.bf16.mxu1 %v2109_v1  ;;  %1043 = vmatpush1.bf16.msra.mxu0 %v2111_v2  ;;  %v2115_v5 = vld [vmem:[#allocation6 + $0x164] ss:$8 sps:$4 sm:$0xff]   ;;  %v2117_v6 = vld [vmem:[#allocation6 + $0x60] ss:$8 sps:$4 sm:$0xff]   ;;  %v2119_v8 = vld [vmem:[#allocation6 + $0x54] ss:$8 sps:$4 sm:$0xff]  }
  0x2c   :  { %1156 = vmatpush1.bf16.msra.mxu1 %v2112_v3  ;;  %1044 = vmatprep.subr.bf16.mxu0 %v2113_v4  ;;  %v2118_v7 = vld [vmem:[#allocation6 + $0x160] ss:$8 sps:$4 sm:$0xff]   ;;  %v2121_v9 = vld [vmem:[#allocation6 + $0x154] ss:$8 sps:$4 sm:$0xff]   ;;  %v2123_v10 = vld [vmem:[#allocation6 + $0x50] ss:$8 sps:$4 sm:$0xff]  }
  0x2d   :  { %1157 = vmatprep.subr.bf16.mxu1 %v2115_v5  ;;  %v2124_v11 = vld [vmem:[#allocation6 + $0x150] ss:$8 sps:$4 sm:$0xff]   ;;  %v2125_v12 = vld [vmem:[#allocation6 + $0x44] ss:$8 sps:$4 sm:$0xff]   ;;  %v2129_v14 = vld [vmem:[#allocation6 + $0x40] ss:$8 sps:$4 sm:$0xff]  }
  0x2e   :  { %v2127_v13 = vld [vmem:[#allocation6 + $0x144] ss:$8 sps:$4 sm:$0xff]   ;;  %v2130_v15 = vld [vmem:[#allocation6 + $0x140] ss:$8 sps:$4 sm:$0xff]   ;;  %v2131_v16 = vld [vmem:[#allocation6 + $0x34] ss:$8 sps:$4 sm:$0xff]  }
  0x2f   :  { %1045 = vmatpush1.bf16.msra.mxu0 %v2117_v6  ;;  %v2133_v17 = vld [vmem:[#allocation6 + $0x134] ss:$8 sps:$4 sm:$0xff]   ;;  %v2135_v18 = vld [vmem:[#allocation6 + $0x30] ss:$8 sps:$4 sm:$0xff]   ;;  %v2137_v20 = vld [vmem:[#allocation6 + $0x24] ss:$8 sps:$4 sm:$0xff]  }
  0x30   :  { %1158 = vmatpush1.bf16.msra.mxu1 %v2118_v7  ;;  %1046 = vmatprep.subr.bf16.mxu0 %v2119_v8  ;;  %v2136_v19 = vld [vmem:[#allocation6 + $0x130] ss:$8 sps:$4 sm:$0xff]   ;;  %v2139_v21 = vld [vmem:[#allocation6 + $0x124] ss:$8 sps:$4 sm:$0xff]   ;;  %v2141_v22 = vld [vmem:[#allocation6 + $0x20] ss:$8 sps:$4 sm:$0xff]  }
  0x31   :  { %1159 = vmatprep.subr.bf16.mxu1 %v2121_v9  ;;  %v2142_v23 = vld [vmem:[#allocation6 + $0x120] ss:$8 sps:$4 sm:$0xff]   ;;  %v2143_v24 = vld [vmem:[#allocation6 + $0x14] ss:$8 sps:$4 sm:$0xff]   ;;  %v2147_v26 = vld [vmem:[#allocation6 + $0x10] ss:$8 sps:$4 sm:$0xff]  }
  0x32   :  { %v2145_v25 = vld [vmem:[#allocation6 + $0x114] ss:$8 sps:$4 sm:$0xff]   ;;  %v2148_v27 = vld [vmem:[#allocation6 + $0x110] ss:$8 sps:$4 sm:$0xff]   ;;  %v2149_v28 = vld [vmem:[#allocation6 + $0x4] ss:$8 sps:$4 sm:$0xff]  }
  0x33   :  { %1047 = vmatpush1.bf16.msra.mxu0 %v2123_v10  ;;  %v2151_v29 = vld [vmem:[#allocation6 + $0x104] ss:$8 sps:$4 sm:$0xff]   ;;  %v2153_v30 = vld [vmem:[#allocation6] ss:$8 sps:$4 sm:$0xff]   ;;  %v2155_v32 = vld [vmem:[#allocation6 + $0xf4] ss:$8 sps:$4 sm:$0xff]  }
  0x34   :  { %1160 = vmatpush1.bf16.msra.mxu1 %v2124_v11  ;;  %1048 = vmatprep.subr.bf16.mxu0 %v2125_v12  ;;  %v2154_v31 = vld [vmem:[#allocation6 + $0x100] ss:$8 sps:$4 sm:$0xff]   ;;  %v2157_v33 = vld [vmem:[#allocation6 + $0x1f4] ss:$8 sps:$4 sm:$0xff]   ;;  %v2159_v34 = vld [vmem:[#allocation6 + $0xf0] ss:$8 sps:$4 sm:$0xff]  }
  0x35   :  { %1161 = vmatprep.subr.bf16.mxu1 %v2127_v13  ;;  %v2160_v35 = vld [vmem:[#allocation6 + $0x1f0] ss:$8 sps:$4 sm:$0xff]   ;;  %v2161_v36 = vld [vmem:[#allocation6 + $0xe4] ss:$8 sps:$4 sm:$0xff]   ;;  %v2165_v38 = vld [vmem:[#allocation6 + $0xe0] ss:$8 sps:$4 sm:$0xff]  }
  0x36   :  { %v2163_v37 = vld [vmem:[#allocation6 + $0x1e4] ss:$8 sps:$4 sm:$0xff]   ;;  %v2166_v39 = vld [vmem:[#allocation6 + $0x1e0] ss:$8 sps:$4 sm:$0xff]   ;;  %v2167_v40 = vld [vmem:[#allocation6 + $0xd4] ss:$8 sps:$4 sm:$0xff]  }
  0x37   :  { %1049 = vmatpush1.bf16.msra.mxu0 %v2129_v14  ;;  %v2169_v41 = vld [vmem:[#allocation6 + $0x1d4] ss:$8 sps:$4 sm:$0xff]   ;;  %v2171_v42 = vld [vmem:[#allocation6 + $0xd0] ss:$8 sps:$4 sm:$0xff]   ;;  %v2173_v44 = vld [vmem:[#allocation6 + $0xc4] ss:$8 sps:$4 sm:$0xff]  }
  0x38   :  { %1162 = vmatpush1.bf16.msra.mxu1 %v2130_v15  ;;  %1050 = vmatprep.subr.bf16.mxu0 %v2131_v16  ;;  %v2172_v43 = vld [vmem:[#allocation6 + $0x1d0] ss:$8 sps:$4 sm:$0xff]   ;;  %v2175_v45 = vld [vmem:[#allocation6 + $0x1c4] ss:$8 sps:$4 sm:$0xff]   ;;  %v2177_v50 = vld [vmem:[#allocation6 + $0xc0] ss:$8 sps:$4 sm:$0xff]  }
  0x39   :  { %1163 = vmatprep.subr.bf16.mxu1 %v2133_v17  ;;  %v71_v46 = vld [vmem:[#allocation3 + $0x8] sm:$0xff]  ;;  %v73_v48 = vld [vmem:[#allocation3 + $0x18] sm:$0xff]  ;;  %v70_v6 = vld [vmem:[#allocation3] sm:$0xff]  ;;  %vm2410_vm0 = vmmov 0   ;;  %s2411_s24 = smov [#allocation9]  }
  0x3a   :  { %v79_v47 = vld [vmem:[#allocation3 + $0x48] sm:$0xff]  ;;  %v81_v49 = vld [vmem:[#allocation3 + $0x58] sm:$0xff]  ;;  %v78_v7 = vld [vmem:[#allocation3 + $0x40] sm:$0xff]  ;;  %s1848_s25 = sshll.u32 %s2411_s24, 4  ;;  %s1849_s25 = int_to_ptr.vmem [resolvable:$true] %s1848_s25 }
  0x3b   :  { %1051 = vmatpush1.bf16.msra.mxu0 %v2135_v18  ;;  %v2178_v51 = vld [vmem:[#allocation6 + $0x1c0] ss:$8 sps:$4 sm:$0xff]   ;;  %v2179_v52 = vld [vmem:[#allocation6 + $0xb4] ss:$8 sps:$4 sm:$0xff]   ;;  %v199_v53 = vpack.c.bf16 %v79_v47, %v71_v46  ;;  %v201_v54 = vpack.c.bf16 %v81_v49, %v73_v48  ;;  %v2183_v56 = vld [vmem:[#allocation6 + $0xb0] ss:$8 sps:$4 sm:$0xff]   ;;  %v198_v16 = vpack.c.bf16 %v78_v7, %v70_v6  ;;  %p2380_p2 = scmp.lt.s32.totalorder %s1849_s25, %s1849_s25 }
  0x3c   :  { %1164 = vmatpush1.bf16.msra.mxu1 %v2136_v19  ;;  %1052 = vmatprep.subr.bf16.mxu0 %v2137_v20  ;;  %v2181_v55 = vld [vmem:[#allocation6 + $0x1b4] ss:$8 sps:$4 sm:$0xff]   ;;  %v2184_v57 = vld [vmem:[#allocation6 + $0x1b0] ss:$8 sps:$4 sm:$0xff]   ;;  %v2185_v58 = vld [vmem:[#allocation6 + $0xa4] ss:$8 sps:$4 sm:$0xff]  }
  0x3d   :  { %1165 = vmatprep.subr.bf16.mxu1 %v2139_v21  ;;  %1074 = vmatprep.mubr.bf16.mxu0 %v199_v53  ;;  %v2187_v59 = vld [vmem:[#allocation6 + $0x1a4] ss:$8 sps:$4 sm:$0xff]   ;;  %v2189_v60 = vld [vmem:[#allocation6 + $0xa0] ss:$8 sps:$4 sm:$0xff]   ;;  %v2191_v62 = vld [vmem:[#allocation6 + $0x94] ss:$8 sps:$4 sm:$0xff]  }
  0x3e   :  { %1187 = vmatprep.mubr.bf16.mxu1 %v201_v54  ;;  %v2190_v61 = vld [vmem:[#allocation6 + $0x1a0] ss:$8 sps:$4 sm:$0xff]   ;;  %v2193_v63 = vld [vmem:[#allocation6 + $0x194] ss:$8 sps:$4 sm:$0xff]   ;;  %v2195_v0 = vld [vmem:[#allocation6 + $0x90] ss:$8 sps:$4 sm:$0xff]  }
  0x3f   :  { %1053 = vmatpush1.bf16.msra.mxu0 %v2141_v22  ;;  %v2196_v1 = vld [vmem:[#allocation6 + $0x190] ss:$8 sps:$4 sm:$0xff]   ;;  %v2197_v2 = vld [vmem:[#allocation6 + $0x84] ss:$8 sps:$4 sm:$0xff]   ;;  %v2201_v4 = vld [vmem:[#allocation6 + $0x80] ss:$8 sps:$4 sm:$0xff]  }
  0x40   :  { %1166 = vmatpush1.bf16.msra.mxu1 %v2142_v23  ;;  %1054 = vmatprep.subr.bf16.mxu0 %v2143_v24  ;;  %v2199_v3 = vld [vmem:[#allocation6 + $0x184] ss:$8 sps:$4 sm:$0xff]   ;;  %v2202_v5 = vld [vmem:[#allocation6 + $0x180] ss:$8 sps:$4 sm:$0xff]   ;;  %v72_v8 = vld [vmem:[#allocation3 + $0x10] sm:$0xff]  ;;  %s2375_s26 = scalar_lea.vmem %s1849_s25, 16 }
  0x41   :  { %1167 = vmatprep.subr.bf16.mxu1 %v2145_v25  ;;  %v80_v9 = vld [vmem:[#allocation3 + $0x50] sm:$0xff]  ;;  %v87_v14 = vld [vmem:[#allocation3 + $0x88] sm:$0xff]  ;;  %v89_v18 = vld [vmem:[#allocation3 + $0x98] sm:$0xff]  ;;  %p2376_p1 = scmp.ne.s32.totalorder %s1849_s25, %s2375_s26  ;;  %s2379_s27 = scalar_lea.vmem %s1849_s25, 32 }
  0x42   :  { %v2205_v10 = vld [vmem:[#allocation6 + $0x274] ss:$8 sps:$4 sm:$0xff]   ;;  %v2203_v12 = vld [vmem:[#allocation6 + $0x270] ss:$8 sps:$4 sm:$0xff]   ;;  %v95_v15 = vld [vmem:[#allocation3 + $0xc8] sm:$0xff]  ;;  %v200_v17 = vpack.c.bf16 %v80_v9, %v72_v8  ;;  %p2381_p3 = scmp.lt.s32.totalorder %s2379_s27, %s2375_s26 }
  0x43   :  { %1055 = vmatpush1.bf16.msra.mxu0 %v2147_v26  ;;  %v2208_v11 = vld [vmem:[#allocation6 + $0x374] ss:$8 sps:$4 sm:$0xff]   ;;  %v2206_v13 = vld [vmem:[#allocation6 + $0x370] ss:$8 sps:$4 sm:$0xff]   ;;  %v2211_v20 = vld [vmem:[#allocation6 + $0x264] ss:$8 sps:$4 sm:$0xff]   ;;  %v207_v23 = vpack.c.bf16 %v95_v15, %v87_v14 }
  0x44   :  { %1168 = vmatpush1.bf16.msra.mxu1 %v2148_v27  ;;  %1056 = vmatprep.subr.bf16.mxu0 %v2149_v28  ;;  %v97_v19 = vld [vmem:[#allocation3 + $0xd8] sm:$0xff]  ;;  %v2214_v21 = vld [vmem:[#allocation6 + $0x364] ss:$8 sps:$4 sm:$0xff]   ;;  %v2209_v22 = vld [vmem:[#allocation6 + $0x260] ss:$8 sps:$4 sm:$0xff]   ;;  %p2382_p4 = por %p2381_p3, %p2380_p2 }
  0x45   :  { %1169 = vmatprep.subr.bf16.mxu1 %v2151_v29  ;;  %v209_v24 = vpack.c.bf16 %v97_v19, %v89_v18  ;;  %v2212_v25 = vld [vmem:[#allocation6 + $0x360] ss:$8 sps:$4 sm:$0xff]   ;;  %v88_v28 = vld [vmem:[#allocation3 + $0x90] sm:$0xff]  ;;  %v137_v14 = vld [vmem:[#allocation3 + $0x218] sm:$0xff] }
  0x46   :  { %v86_v26 = vld [vmem:[#allocation3 + $0x80] sm:$0xff]  ;;  %v96_v29 = vld [vmem:[#allocation3 + $0xd0] sm:$0xff]  ;;  %v119_v54 = vld [vmem:[#allocation3 + $0x188] sm:$0xff]  ;;  %p2383_p5 = pnand %p2382_p4, %p2376_p1 }
  0x47   :  { %1057 = vmatpush1.bf16.msra.mxu0 %v2153_v30  ;;  %v94_v27 = vld [vmem:[#allocation3 + $0xc0] sm:$0xff]  ;;  %v2217_v30 = vld [vmem:[#allocation6 + $0x254] ss:$8 sps:$4 sm:$0xff]   ;;  %v2230_v53 = vld [vmem:[#allocation6 + $0x330] ss:$8 sps:$4 sm:$0xff]  }
  0x48   :  { %1170 = vmatpush1.bf16.msra.mxu1 %v2154_v31  ;;  %1058 = vmatprep.subr.bf16.mxu0 %v2155_v32  ;;  %v2220_v31 = vld [vmem:[#allocation6 + $0x354] ss:$8 sps:$4 sm:$0xff]   ;;  %v2215_v32 = vld [vmem:[#allocation6 + $0x250] ss:$8 sps:$4 sm:$0xff]   ;;  %v102_v46 = vld [vmem:[#allocation3 + $0x100] sm:$0xff] }
  0x49   :  { %1171 = vmatprep.subr.bf16.mxu1 %v2157_v33  ;;  %v2218_v33 = vld [vmem:[#allocation6 + $0x350] ss:$8 sps:$4 sm:$0xff]   ;;  %v110_v47 = vld [vmem:[#allocation3 + $0x140] sm:$0xff]  ;;  %v2241_v6 = vld [vmem:[#allocation6 + $0x214] ss:$8 sps:$4 sm:$0xff]  }
  0x4a   :  { %v104_v48 = vld [vmem:[#allocation3 + $0x110] sm:$0xff]  ;;  %v145_v15 = vld [vmem:[#allocation3 + $0x258] sm:$0xff]  ;;  %v2245_v18 = vld [vmem:[#allocation6 + $0x200] ss:$8 sps:$4 sm:$0xff]  }
  0x4b   :  { %1059 = vmatpush2.bf16.msra.mxu0 %v2159_v34  ;;  %v103_v34 = vld [vmem:[#allocation3 + $0x108] sm:$0xff]  ;;  %v112_v49 = vld [vmem:[#allocation3 + $0x150] sm:$0xff] }
  0x4c   :  { %1172 = vmatpush2.bf16.msra.mxu1 %v2160_v35  ;;  %1060 = vmatprep.subr.bf16.mxu0 %v2161_v36  ;;  %v111_v35 = vld [vmem:[#allocation3 + $0x148] sm:$0xff]  ;;  %v206_v36 = vpack.c.bf16 %v94_v27, %v86_v26  ;;  %v2244_v7 = vld [vmem:[#allocation6 + $0x314] ss:$8 sps:$4 sm:$0xff]   ;;  %v2239_v8 = vld [vmem:[#allocation6 + $0x210] ss:$8 sps:$4 sm:$0xff]  }
  0x4d   :  { %1173 = vmatprep.subr.bf16.mxu1 %v2163_v37  ;;  %v208_v37 = vpack.c.bf16 %v96_v29, %v88_v28  ;;  %v2242_v9 = vld [vmem:[#allocation6 + $0x310] ss:$8 sps:$4 sm:$0xff]   ;;  %v2253_v26 = vld [vmem:[#allocation6 + $0x2f4] ss:$8 sps:$4 sm:$0xff]  }
  0x4e   :  { %v2256_v27 = vld [vmem:[#allocation6 + $0x3f4] ss:$8 sps:$4 sm:$0xff]   ;;  %v2251_v28 = vld [vmem:[#allocation6 + $0x2f0] ss:$8 sps:$4 sm:$0xff]  }
  0x4f   :  { %1061 = vmatpush2.bf16.msra.mxu0 %v2165_v38  ;;  %v105_v38 = vld [vmem:[#allocation3 + $0x118] sm:$0xff] }
  0x50   :  { %1174 = vmatpush2.bf16.msra.mxu1 %v2166_v39  ;;  %1062 = vmatprep.subr.bf16.mxu0 %v2167_v40  ;;  %v113_v39 = vld [vmem:[#allocation3 + $0x158] sm:$0xff]  ;;  %v2223_v40 = vld [vmem:[#allocation6 + $0x244] ss:$8 sps:$4 sm:$0xff]  }
  0x51   :  { %1175 = vmatprep.subr.bf16.mxu1 %v2169_v41  ;;  %v2226_v41 = vld [vmem:[#allocation6 + $0x344] ss:$8 sps:$4 sm:$0xff]   ;;  %v2254_v29 = vld [vmem:[#allocation6 + $0x3f0] ss:$8 sps:$4 sm:$0xff]  }
  0x53   :  { %1063 = vmatpush2.bf16.msra.mxu0 %v2171_v42  ;;  %v2221_v42 = vld [vmem:[#allocation6 + $0x240] ss:$8 sps:$4 sm:$0xff]  }
  0x54   :  { %1176 = vmatpush2.bf16.msra.mxu1 %v2172_v43  ;;  %1064 = vmatprep.subr.bf16.mxu0 %v2173_v44  ;;  %v215_v43 = vpack.c.bf16 %v111_v35, %v103_v34  ;;  %v217_v44 = vpack.c.bf16 %v113_v39, %v105_v38  ;;  %v153_v34 = vld [vmem:[#allocation3 + $0x298] sm:$0xff]  ;;  %v2257_v38 = vld [vmem:[#allocation6 + $0x2e0] ss:$8 sps:$4 sm:$0xff]  }
  0x55   :  { %1177 = vmatprep.subr.bf16.mxu1 %v2175_v45  ;;  %v2224_v45 = vld [vmem:[#allocation6 + $0x340] ss:$8 sps:$4 sm:$0xff]   ;;  %v161_v35 = vld [vmem:[#allocation3 + $0x2d8] sm:$0xff] }
  0x57   :  { %1065 = vmatpush2.bf16.msra.mxu0 %v2177_v50  ;;  %v2229_v50 = vld [vmem:[#allocation6 + $0x234] ss:$8 sps:$4 sm:$0xff]  }
  0x58   :  { %1178 = vmatpush2.bf16.msra.mxu1 %v2178_v51  ;;  %1066 = vmatprep.subr.bf16.mxu0 %v2179_v52  ;;  %v2232_v51 = vld [vmem:[#allocation6 + $0x334] ss:$8 sps:$4 sm:$0xff]   ;;  %v2227_v52 = vld [vmem:[#allocation6 + $0x230] ss:$8 sps:$4 sm:$0xff]  }
  0x59   :  { %1179 = vmatprep.subr.bf16.mxu1 %v2181_v55  ;;  %v127_v55 = vld [vmem:[#allocation3 + $0x1c8] sm:$0xff] }
  0x5b   :  { %1067 = vmatpush2.bf16.msra.mxu0 %v2183_v56  ;;  %v214_v56 = vpack.c.bf16 %v110_v47, %v102_v46  ;;  %v2265_v46 = vld [vmem:[#allocation6 + $0x2d4] ss:$8 sps:$4 sm:$0xff]  }
  0x5c   :  { %1180 = vmatpush2.bf16.msra.mxu1 %v2184_v57  ;;  %1068 = vmatprep.subr.bf16.mxu0 %v2185_v58  ;;  %v216_v57 = vpack.c.bf16 %v112_v49, %v104_v48  ;;  %v121_v58 = vld [vmem:[#allocation3 + $0x198] sm:$0xff] }
  0x5d   :  { %1181 = vmatprep.subr.bf16.mxu1 %v2187_v59  ;;  %v129_v59 = vld [vmem:[#allocation3 + $0x1d8] sm:$0xff] }
  0x5e   :  { %v2268_v47 = vld [vmem:[#allocation6 + $0x3d4] ss:$8 sps:$4 sm:$0xff]   ;;  %v2263_v48 = vld [vmem:[#allocation6 + $0x2d0] ss:$8 sps:$4 sm:$0xff]  }
  0x5f   :  { %1069 = vmatpush2.bf16.msra.mxu0 %v2189_v60  ;;  %v2235_v60 = vld [vmem:[#allocation6 + $0x224] ss:$8 sps:$4 sm:$0xff]   ;;  %v2266_v49 = vld [vmem:[#allocation6 + $0x3d0] ss:$8 sps:$4 sm:$0xff]  }
  0x60   :  { %1182 = vmatpush2.bf16.msra.mxu1 %v2190_v61  ;;  %1070 = vmatprep.subr.bf16.mxu0 %v2191_v62  ;;  %v2238_v61 = vld [vmem:[#allocation6 + $0x324] ss:$8 sps:$4 sm:$0xff]   ;;  %v2233_v62 = vld [vmem:[#allocation6 + $0x220] ss:$8 sps:$4 sm:$0xff]  }
  0x61   :  { %1183 = vmatprep.subr.bf16.mxu1 %v2193_v63  ;;  %v223_v63 = vpack.c.bf16 %v127_v55, %v119_v54  ;;  %v169_v54 = vld [vmem:[#allocation3 + $0x318] sm:$0xff] }
  0x62   :  { %v177_v55 = vld [vmem:[#allocation3 + $0x358] sm:$0xff] }
  0x63   :  { %1071 = vmatpush2.bf16.msra.mxu0 %v2195_v0  ;;  %v225_v0 = vpack.c.bf16 %v129_v59, %v121_v58  ;;  %v249_v59 = vpack.c.bf16 %v177_v55, %v169_v54  ;;  %v107_v54 = vld [vmem:[#allocation3 + $0x128] sm:$0xff] }
  0x64   :  { %1184 = vmatpush2.bf16.msra.mxu1 %v2196_v1  ;;  %1072 = vmatprep.subr.bf16.mxu0 %v2197_v2  ;;  %v2236_v1 = vld [vmem:[#allocation6 + $0x320] ss:$8 sps:$4 sm:$0xff]  }
  0x65   :  { %1185 = vmatprep.subr.bf16.mxu1 %v2199_v3  ;;  %v118_v2 = vld [vmem:[#allocation3 + $0x180] sm:$0xff]  ;;  %v115_v55 = vld [vmem:[#allocation3 + $0x168] sm:$0xff] }
  0x66   :  { %v126_v3 = vld [vmem:[#allocation3 + $0x1c0] sm:$0xff] }
  0x67   :  { %1073 = vmatpush2.bf16.msra.mxu0 %v2201_v4  ;;  %v120_v4 = vld [vmem:[#allocation3 + $0x190] sm:$0xff] }
  0x68   :  { %1186 = vmatpush2.bf16.msra.mxu1 %v2202_v5  ;;  %1268 = vmatprep.subr.bf16.mxu0 %v2205_v10  ;;  %v128_v5 = vld [vmem:[#allocation3 + $0x1d0] sm:$0xff]  ;;  %v135_v10 = vld [vmem:[#allocation3 + $0x208] sm:$0xff] }
  0x69   :  { %1381 = vmatprep.subr.bf16.mxu1 %v2208_v11  ;;  %v143_v11 = vld [vmem:[#allocation3 + $0x248] sm:$0xff] }
  0x6a   :  { %1075 = vmatmul.mubr.bf16.vlgmr.msra.gmra.mxu0 %v198_v16  ;;  %v2247_v16 = vld [vmem:[#allocation6 + $0x204] ss:$8 sps:$4 sm:$0xff]   ;;  %v231_v19 = vpack.c.bf16 %v143_v11, %v135_v10  ;;  %v2275_v10 = vld [vmem:[#allocation6 + $0x2b0] ss:$8 sps:$4 sm:$0xff]  }
  0x6b   :  { %1188 = vmatmul.mubr.bf16.vlgmr.msra.gmra.mxu1 %v200_v17  ;;  %1269 = vmatpush1.bf16.msra.mxu0 %v2203_v12  ;;  %v222_v12 = vpack.c.bf16 %v126_v3, %v118_v2  ;;  %v2250_v17 = vld [vmem:[#allocation6 + $0x304] ss:$8 sps:$4 sm:$0xff]   ;;  %v2277_v2 = vld [vmem:[#allocation6 + $0x2b4] ss:$8 sps:$4 sm:$0xff]   ;;  %v2278_v11 = vld [vmem:[#allocation6 + $0x3b0] ss:$8 sps:$4 sm:$0xff]  }
  0x6c   :  { %1382 = vmatpush1.bf16.msra.mxu1 %v2206_v13  ;;  %1270 = vmatprep.subr.bf16.mxu0 %v2211_v20  ;;  %v224_v13 = vpack.c.bf16 %v128_v5, %v120_v4  ;;  %v233_v20 = vpack.c.bf16 %v145_v15, %v137_v14  ;;  %v2280_v3 = vld [vmem:[#allocation6 + $0x3b4] ss:$8 sps:$4 sm:$0xff]   ;;  %v183_v4 = vld [vmem:[#allocation3 + $0x388] sm:$0xff] }
  0x6d   :  { %1383 = vmatprep.subr.bf16.mxu1 %v2214_v21  ;;  %1084 = vmatprep.mubr.bf16.mxu0 %v207_v23  ;;  %v2248_v21 = vld [vmem:[#allocation6 + $0x300] ss:$8 sps:$4 sm:$0xff]  }
  0x6e   :  { %1197 = vmatprep.mubr.bf16.mxu1 %v209_v24  ;;  %v142_v23 = vld [vmem:[#allocation3 + $0x240] sm:$0xff]  ;;  %v136_v24 = vld [vmem:[#allocation3 + $0x210] sm:$0xff] }
  0x6f   :  { %1271 = vmatpush1.bf16.msra.mxu0 %v2209_v22  ;;  %v134_v22 = vld [vmem:[#allocation3 + $0x200] sm:$0xff] }
  0x70   :  { %1384 = vmatpush1.bf16.msra.mxu1 %v2212_v25  ;;  %1272 = vmatprep.subr.bf16.mxu0 %v2217_v30  ;;  %v144_v25 = vld [vmem:[#allocation3 + $0x250] sm:$0xff]  ;;  %v151_v30 = vld [vmem:[#allocation3 + $0x288] sm:$0xff] }
  0x71   :  { %1385 = vmatprep.subr.bf16.mxu1 %v2220_v31  ;;  %v159_v31 = vld [vmem:[#allocation3 + $0x2c8] sm:$0xff] }
  0x72   :  { %1085 = vmatmul.mubr.bf16.gmra.mxu0 %v206_v36  ;;  %v2259_v36 = vld [vmem:[#allocation6 + $0x2e4] ss:$8 sps:$4 sm:$0xff]   ;;  %v239_v39 = vpack.c.bf16 %v159_v31, %v151_v30  ;;  %v2287_v30 = vld [vmem:[#allocation6 + $0x290] ss:$8 sps:$4 sm:$0xff]  }
  0x73   :  { %1198 = vmatmul.mubr.bf16.gmra.mxu1 %v208_v37  ;;  %1273 = vmatpush1.bf16.msra.mxu0 %v2215_v32  ;;  %v230_v32 = vpack.c.bf16 %v142_v23, %v134_v22  ;;  %v2262_v37 = vld [vmem:[#allocation6 + $0x3e4] ss:$8 sps:$4 sm:$0xff]   ;;  %v2289_v22 = vld [vmem:[#allocation6 + $0x294] ss:$8 sps:$4 sm:$0xff]   ;;  %v2290_v31 = vld [vmem:[#allocation6 + $0x390] ss:$8 sps:$4 sm:$0xff]  }
  0x74   :  { %1386 = vmatpush1.bf16.msra.mxu1 %v2218_v33  ;;  %1274 = vmatprep.subr.bf16.mxu0 %v2223_v40  ;;  %v232_v33 = vpack.c.bf16 %v144_v25, %v136_v24  ;;  %v241_v40 = vpack.c.bf16 %v161_v35, %v153_v34  ;;  %v2292_v23 = vld [vmem:[#allocation6 + $0x394] ss:$8 sps:$4 sm:$0xff]   ;;  %v75_v24 = vld [vmem:[#allocation3 + $0x28] sm:$0xff] }
  0x75   :  { %1387 = vmatprep.subr.bf16.mxu1 %v2226_v41  ;;  %1094 = vmatprep.mubr.bf16.mxu0 %v215_v43  ;;  %v2260_v41 = vld [vmem:[#allocation6 + $0x3e0] ss:$8 sps:$4 sm:$0xff]  }
  0x76   :  { %1207 = vmatprep.mubr.bf16.mxu1 %v217_v44  ;;  %v158_v43 = vld [vmem:[#allocation3 + $0x2c0] sm:$0xff]  ;;  %v152_v44 = vld [vmem:[#allocation3 + $0x290] sm:$0xff] }
  0x77   :  { %1275 = vmatpush1.bf16.msra.mxu0 %v2221_v42  ;;  %v150_v42 = vld [vmem:[#allocation3 + $0x280] sm:$0xff] }
  0x78   :  { %1388 = vmatpush1.bf16.msra.mxu1 %v2224_v45  ;;  %1276 = vmatprep.subr.bf16.mxu0 %v2229_v50  ;;  %v160_v45 = vld [vmem:[#allocation3 + $0x2d0] sm:$0xff]  ;;  %v167_v50 = vld [vmem:[#allocation3 + $0x308] sm:$0xff] }
  0x79   :  { %1389 = vmatprep.subr.bf16.mxu1 %v2232_v51  ;;  %v175_v51 = vld [vmem:[#allocation3 + $0x348] sm:$0xff] }
  0x7a   :  { %1095 = vmatmul.mubr.bf16.gmra.mxu0 %v214_v56  ;;  %v2271_v56 = vld [vmem:[#allocation6 + $0x2c4] ss:$8 sps:$4 sm:$0xff]   ;;  %v247_v58 = vpack.c.bf16 %v175_v51, %v167_v50  ;;  %v2293_v34 = vld [vmem:[#allocation6 + $0x280] ss:$8 sps:$4 sm:$0xff]  }
  0x7b   :  { %1208 = vmatmul.mubr.bf16.gmra.mxu1 %v216_v57  ;;  %1277 = vmatpush1.bf16.msra.mxu0 %v2227_v52  ;;  %v238_v52 = vpack.c.bf16 %v158_v43, %v150_v42  ;;  %v2274_v57 = vld [vmem:[#allocation6 + $0x3c4] ss:$8 sps:$4 sm:$0xff]  }
  0x7c   :  { %1390 = vmatpush1.bf16.msra.mxu1 %v2230_v53  ;;  %1278 = vmatprep.subr.bf16.mxu0 %v2235_v60  ;;  %v240_v53 = vpack.c.bf16 %v160_v45, %v152_v44  ;;  %v2269_v60 = vld [vmem:[#allocation6 + $0x2c0] ss:$8 sps:$4 sm:$0xff]   ;;  %v93_v44 = vld [vmem:[#allocation3 + $0xb8] sm:$0xff] }
  0x7d   :  { %1391 = vmatprep.subr.bf16.mxu1 %v2238_v61  ;;  %1104 = vmatprep.mubr.bf16.mxu0 %v223_v63  ;;  %v2272_v61 = vld [vmem:[#allocation6 + $0x3c0] ss:$8 sps:$4 sm:$0xff]   ;;  %v101_v45 = vld [vmem:[#allocation3 + $0xf8] sm:$0xff] }
  0x7e   :  { %1217 = vmatprep.mubr.bf16.mxu1 %v225_v0  ;;  %v174_v63 = vld [vmem:[#allocation3 + $0x340] sm:$0xff]  ;;  %v168_v0 = vld [vmem:[#allocation3 + $0x310] sm:$0xff]  ;;  %v91_v42 = vld [vmem:[#allocation3 + $0xa8] sm:$0xff] }
  0x7f   :  { %1279 = vmatpush1.bf16.msra.mxu0 %v2233_v62  ;;  %v166_v62 = vld [vmem:[#allocation3 + $0x300] sm:$0xff]  ;;  %v99_v43 = vld [vmem:[#allocation3 + $0xe8] sm:$0xff] }
  0x80   :  { %1392 = vmatpush1.bf16.msra.mxu1 %v2236_v1  ;;  %1280 = vmatprep.subr.bf16.mxu0 %v2241_v6  ;;  %v176_v1 = vld [vmem:[#allocation3 + $0x350] sm:$0xff]  ;;  %v246_v5 = vpack.c.bf16 %v174_v63, %v166_v62  ;;  %v90_v50 = vld [vmem:[#allocation3 + $0xa0] sm:$0xff] }
  0x81   :  { %1393 = vmatprep.subr.bf16.mxu1 %v2244_v7  ;;  %v248_v6 = vpack.c.bf16 %v176_v1, %v168_v0  ;;  %v191_v7 = vld [vmem:[#allocation3 + $0x3c8] sm:$0xff]  ;;  %v98_v51 = vld [vmem:[#allocation3 + $0xe0] sm:$0xff]  ;;  %v108_v0 = vld [vmem:[#allocation3 + $0x130] sm:$0xff] }
  0x82   :  { %1105 = vmatmul.mubr.bf16.gmra.mxu0 %v222_v12  ;;  %v2283_v12 = vld [vmem:[#allocation6 + $0x2a4] ss:$8 sps:$4 sm:$0xff]   ;;  %v255_v14 = vpack.c.bf16 %v191_v7, %v183_v4  ;;  %v116_v1 = vld [vmem:[#allocation3 + $0x170] sm:$0xff]  ;;  %v125_v4 = vld [vmem:[#allocation3 + $0x1b8] sm:$0xff] }
  0x83   :  { %1218 = vmatmul.mubr.bf16.gmra.mxu1 %v224_v13  ;;  %1281 = vmatpush1.bf16.msra.mxu0 %v2239_v8  ;;  %v185_v8 = vld [vmem:[#allocation3 + $0x398] sm:$0xff]  ;;  %v2286_v13 = vld [vmem:[#allocation6 + $0x3a4] ss:$8 sps:$4 sm:$0xff]   ;;  %v220_v7 = vpack.c.bf16 %v116_v1, %v108_v0 }
  0x84   :  { %1394 = vmatpush1.bf16.msra.mxu1 %v2242_v9  ;;  %1282 = vmatprep.subr.bf16.mxu0 %v2247_v16  ;;  %v193_v9 = vld [vmem:[#allocation3 + $0x3d8] sm:$0xff]  ;;  %v2281_v16 = vld [vmem:[#allocation6 + $0x2a0] ss:$8 sps:$4 sm:$0xff]  }
  0x85   :  { %1395 = vmatprep.subr.bf16.mxu1 %v2250_v17  ;;  %1114 = vmatprep.mubr.bf16.mxu0 %v231_v19  ;;  %v257_v15 = vpack.c.bf16 %v193_v9, %v185_v8  ;;  %v2284_v17 = vld [vmem:[#allocation6 + $0x3a0] ss:$8 sps:$4 sm:$0xff]  }
  0x86   :  { %1227 = vmatprep.mubr.bf16.mxu1 %v233_v20  ;;  %v190_v19 = vld [vmem:[#allocation3 + $0x3c0] sm:$0xff]  ;;  %v184_v20 = vld [vmem:[#allocation3 + $0x390] sm:$0xff] }
  0x87   :  { %1283 = vmatpush1.bf16.msra.mxu0 %v2245_v18  ;;  %v182_v18 = vld [vmem:[#allocation3 + $0x380] sm:$0xff] }
  0x88   :  { %1396 = vmatpush1.bf16.msra.mxu1 %v2248_v21  ;;  %1284 = vmatprep.subr.bf16.mxu0 %v2253_v26  ;;  %v192_v21 = vld [vmem:[#allocation3 + $0x3d0] sm:$0xff]  ;;  %v254_v25 = vpack.c.bf16 %v190_v19, %v182_v18  ;;  %v106_v62 = vld [vmem:[#allocation3 + $0x120] sm:$0xff]  ;;  %v2299_v18 = vld [vmem:[#allocation8 + $0x78] sm:$0xff]  }
  0x89   :  { %1397 = vmatprep.subr.bf16.mxu1 %v2256_v27  ;;  %v256_v26 = vpack.c.bf16 %v192_v21, %v184_v20  ;;  %v83_v27 = vld [vmem:[#allocation3 + $0x68] sm:$0xff]  ;;  %v114_v63 = vld [vmem:[#allocation3 + $0x160] sm:$0xff]  ;;  %v2300_v19 = vld [vmem:[#allocation8 + $0x38] sm:$0xff]  }
  0x8a   :  { %1115 = vmatmul.mubr.bf16.gmra.mxu0 %v230_v32  ;;  %v2295_v32 = vld [vmem:[#allocation6 + $0x284] ss:$8 sps:$4 sm:$0xff]   ;;  %v203_v35 = vpack.c.bf16 %v83_v27, %v75_v24  ;;  %v148_v27 = vld [vmem:[#allocation3 + $0x270] sm:$0xff] }
  0x8b   :  { %1228 = vmatmul.mubr.bf16.gmra.mxu1 %v232_v33  ;;  %1285 = vmatpush2.bf16.msra.mxu0 %v2251_v28  ;;  %v77_v28 = vld [vmem:[#allocation3 + $0x38] sm:$0xff]  ;;  %v2298_v33 = vld [vmem:[#allocation6 + $0x384] ss:$8 sps:$4 sm:$0xff]  }
  0x8c   :  { %1398 = vmatpush2.bf16.msra.mxu1 %v2254_v29  ;;  %1286 = vmatprep.subr.bf16.mxu0 %v2259_v36  ;;  %v85_v29 = vld [vmem:[#allocation3 + $0x78] sm:$0xff]  ;;  %v138_v24 = vld [vmem:[#allocation3 + $0x220] sm:$0xff] }
  0x8d   :  { %1399 = vmatprep.subr.bf16.mxu1 %v2262_v37  ;;  %1124 = vmatprep.mubr.bf16.mxu0 %v239_v39  ;;  %v205_v36 = vpack.c.bf16 %v85_v29, %v77_v28  ;;  %v2296_v37 = vld [vmem:[#allocation6 + $0x380] ss:$8 sps:$4 sm:$0xff]  }
  0x8e   :  { %1237 = vmatprep.mubr.bf16.mxu1 %v241_v40  ;;  %v82_v39 = vld [vmem:[#allocation3 + $0x60] sm:$0xff]  ;;  %v76_v40 = vld [vmem:[#allocation3 + $0x30] sm:$0xff]  ;;  %v155_v28 = vld [vmem:[#allocation3 + $0x2a8] sm:$0xff] }
  0x8f   :  { %1287 = vmatpush2.bf16.msra.mxu0 %v2257_v38  ;;  %v74_v38 = vld [vmem:[#allocation3 + $0x20] sm:$0xff]  ;;  %v163_v29 = vld [vmem:[#allocation3 + $0x2e8] sm:$0xff] }
  0x90   :  { %1400 = vmatpush2.bf16.msra.mxu1 %v2260_v41  ;;  %1288 = vmatprep.subr.bf16.mxu0 %v2265_v46  ;;  %v84_v41 = vld [vmem:[#allocation3 + $0x70] sm:$0xff]  ;;  %v202_v46 = vpack.c.bf16 %v82_v39, %v74_v38  ;;  %v154_v38 = vld [vmem:[#allocation3 + $0x2a0] sm:$0xff] }
  0x91   :  { %1401 = vmatprep.subr.bf16.mxu1 %v2268_v47  ;;  %v204_v47 = vpack.c.bf16 %v84_v41, %v76_v40  ;;  %v162_v39 = vld [vmem:[#allocation3 + $0x2e0] sm:$0xff]  ;;  %v156_v40 = vld [vmem:[#allocation3 + $0x2b0] sm:$0xff] }
  0x92   :  { %1125 = vmatmul.mubr.bf16.gmra.mxu0 %v238_v52  ;;  %v92_v52 = vld [vmem:[#allocation3 + $0xb0] sm:$0xff] }
  0x93   :  { %1238 = vmatmul.mubr.bf16.gmra.mxu1 %v240_v53  ;;  %1289 = vmatpush2.bf16.msra.mxu0 %v2263_v48  ;;  %v211_v48 = vpack.c.bf16 %v99_v43, %v91_v42  ;;  %v100_v53 = vld [vmem:[#allocation3 + $0xf0] sm:$0xff]  ;;  %v171_v42 = vld [vmem:[#allocation3 + $0x328] sm:$0xff] }
  0x94   :  { %1402 = vmatpush2.bf16.msra.mxu1 %v2266_v49  ;;  %1290 = vmatprep.subr.bf16.mxu0 %v2271_v56  ;;  %v213_v49 = vpack.c.bf16 %v101_v45, %v93_v44  ;;  %v109_v56 = vld [vmem:[#allocation3 + $0x138] sm:$0xff]  ;;  %v164_v41 = vld [vmem:[#allocation3 + $0x2f0] sm:$0xff]  ;;  %v179_v43 = vld [vmem:[#allocation3 + $0x368] sm:$0xff] }
  0x95   :  { %1403 = vmatprep.subr.bf16.mxu1 %v2274_v57  ;;  %1134 = vmatprep.mubr.bf16.mxu0 %v247_v58  ;;  %v117_v57 = vld [vmem:[#allocation3 + $0x178] sm:$0xff]  ;;  %v210_v58 = vpack.c.bf16 %v98_v51, %v90_v50  ;;  %v251_v50 = vpack.c.bf16 %v179_v43, %v171_v42 }
  0x96   :  { %1247 = vmatprep.mubr.bf16.mxu1 %v249_v59  ;;  %v212_v59 = vpack.c.bf16 %v100_v53, %v92_v52  ;;  %v173_v44 = vld [vmem:[#allocation3 + $0x338] sm:$0xff]  ;;  %v170_v52 = vld [vmem:[#allocation3 + $0x320] sm:$0xff] }
  0x97   :  { %1291 = vmatpush2.bf16.msra.mxu0 %v2269_v60  ;;  %v219_v60 = vpack.c.bf16 %v115_v55, %v107_v54  ;;  %v181_v45 = vld [vmem:[#allocation3 + $0x378] sm:$0xff]  ;;  %v178_v53 = vld [vmem:[#allocation3 + $0x360] sm:$0xff]  ;;  %v172_v54 = vld [vmem:[#allocation3 + $0x330] sm:$0xff] }
  0x98   :  { %1404 = vmatpush2.bf16.msra.mxu1 %v2272_v61  ;;  %1292 = vmatprep.subr.bf16.mxu0 %v2277_v2  ;;  %v221_v61 = vpack.c.bf16 %v117_v57, %v109_v56  ;;  %v123_v2 = vld [vmem:[#allocation3 + $0x1a8] sm:$0xff]  ;;  %v253_v51 = vpack.c.bf16 %v181_v45, %v173_v44  ;;  %v180_v55 = vld [vmem:[#allocation3 + $0x370] sm:$0xff] }
  0x99   :  { %1405 = vmatprep.subr.bf16.mxu1 %v2280_v3  ;;  %v131_v3 = vld [vmem:[#allocation3 + $0x1e8] sm:$0xff] }
  0x9a   :  { %1135 = vmatmul.mubr.bf16.gmra.mxu0 %v246_v5  ;;  %v133_v5 = vld [vmem:[#allocation3 + $0x1f8] sm:$0xff]  ;;  %v227_v8 = vpack.c.bf16 %v131_v3, %v123_v2  ;;  %v187_v56 = vld [vmem:[#allocation3 + $0x3a8] sm:$0xff]  ;;  %v186_v2 = vld [vmem:[#allocation3 + $0x3a0] sm:$0xff] }
  0x9b   :  { %1248 = vmatmul.mubr.bf16.gmra.mxu1 %v248_v6  ;;  %1293 = vmatpush2.bf16.msra.mxu0 %v2275_v10  ;;  %v218_v6 = vpack.c.bf16 %v114_v63, %v106_v62  ;;  %v229_v9 = vpack.c.bf16 %v133_v5, %v125_v4  ;;  %v122_v10 = vld [vmem:[#allocation3 + $0x1a0] sm:$0xff]  ;;  %v195_v57 = vld [vmem:[#allocation3 + $0x3e8] sm:$0xff]  ;;  %v250_v62 = vpack.c.bf16 %v178_v53, %v170_v52  ;;  %v188_v4 = vld [vmem:[#allocation3 + $0x3b0] sm:$0xff] }
  0x9c   :  { %1406 = vmatpush2.bf16.msra.mxu1 %v2278_v11  ;;  %1294 = vmatprep.subr.bf16.mxu0 %v2283_v12  ;;  %v130_v11 = vld [vmem:[#allocation3 + $0x1e0] sm:$0xff]  ;;  %v124_v12 = vld [vmem:[#allocation3 + $0x1b0] sm:$0xff]  ;;  %v252_v63 = vpack.c.bf16 %v180_v55, %v172_v54  ;;  %v259_v0 = vpack.c.bf16 %v195_v57, %v187_v56 }
  0x9d   :  { %1407 = vmatprep.subr.bf16.mxu1 %v2286_v13  ;;  %1144 = vmatprep.mubr.bf16.mxu0 %v255_v14  ;;  %v132_v13 = vld [vmem:[#allocation3 + $0x1f0] sm:$0xff]  ;;  %v139_v14 = vld [vmem:[#allocation3 + $0x228] sm:$0xff]  ;;  %v226_v20 = vpack.c.bf16 %v130_v11, %v122_v10  ;;  %v194_v3 = vld [vmem:[#allocation3 + $0x3e0] sm:$0xff] }
  0x9e   :  { %1257 = vmatprep.mubr.bf16.mxu1 %v257_v15  ;;  %v147_v15 = vld [vmem:[#allocation3 + $0x268] sm:$0xff]  ;;  %v228_v21 = vpack.c.bf16 %v132_v13, %v124_v12  ;;  %v196_v5 = vld [vmem:[#allocation3 + $0x3f0] sm:$0xff] }
  0x9f   :  { %1295 = vmatpush2.bf16.msra.mxu0 %v2281_v16  ;;  %v141_v16 = vld [vmem:[#allocation3 + $0x238] sm:$0xff]  ;;  %v2309_v10 = vld [vmem:[#allocation8 + $0x50] sm:$0xff]   ;;  %v2311_v12 = vld [vmem:[#allocation8 + $0x48] sm:$0xff]  }
  0xa0   :  { %1408 = vmatpush2.bf16.msra.mxu1 %v2284_v17  ;;  %1296 = vmatprep.subr.bf16.mxu0 %v2289_v22  ;;  %v149_v17 = vld [vmem:[#allocation3 + $0x278] sm:$0xff]  ;;  %v235_v22 = vpack.c.bf16 %v147_v15, %v139_v14  ;;  %v2310_v11 = vld [vmem:[#allocation8 + $0x10] sm:$0xff]   ;;  %v2312_v13 = vld [vmem:[#allocation8 + $0x8] sm:$0xff]  }
  0xa1   :  { %1409 = vmatprep.subr.bf16.mxu1 %v2292_v23  ;;  %v237_v23 = vpack.c.bf16 %v149_v17, %v141_v16  ;;  %v2313_v14 = vld [vmem:[#allocation8 + $0x40] sm:$0xff]   ;;  %v392_v16 = vlaneseq }
  0xa2   :  { %1145 = vmatmul.mubr.bf16.gmra.mxu0 %v254_v25  ;;  %v146_v25 = vld [vmem:[#allocation3 + $0x260] sm:$0xff] }
  0xa3   :  { %1258 = vmatmul.mubr.bf16.gmra.mxu1 %v256_v26  ;;  %1297 = vmatpush2.bf16.msra.mxu0 %v2287_v30  ;;  %v140_v26 = vld [vmem:[#allocation3 + $0x230] sm:$0xff]  ;;  %v157_v30 = vld [vmem:[#allocation3 + $0x2b8] sm:$0xff]  ;;  %v2314_v15 = vld [vmem:[#allocation8] sm:$0xff]   ;;  %v393_v17 = vshrl.u32 %v392_v16, 7 }
  0xa4   :  { %1410 = vmatpush2.bf16.msra.mxu1 %v2290_v31  ;;  %1298 = vmatprep.subr.bf16.mxu0 %v2295_v32  ;;  %v165_v31 = vld [vmem:[#allocation3 + $0x2f8] sm:$0xff]  ;;  %v2301_v32 = vld [vmem:[#allocation8 + $0x70] sm:$0xff]  }
  0xa5   :  { %1411 = vmatprep.subr.bf16.mxu1 %v2298_v33  ;;  %1300 = vmatprep.mubr.bf16.mxu0 %v203_v35  ;;  %v2302_v33 = vld [vmem:[#allocation8 + $0x30] sm:$0xff]   ;;  %v236_v35 = vpack.c.bf16 %v148_v27, %v140_v26 }
  0xa6   :  { %1413 = vmatprep.mubr.bf16.mxu1 %v205_v36  ;;  %v243_v36 = vpack.c.bf16 %v163_v29, %v155_v28 }
  0xa7   :  { %1299 = vmatpush2.bf16.msra.mxu0 %v2293_v34  ;;  %v234_v34 = vpack.c.bf16 %v146_v25, %v138_v24 }
  0xa8   :  { %1412 = vmatpush2.bf16.msra.mxu1 %v2296_v37  ;;  %2003 = vmatprep.subr.bf16.mxu0 %v2299_v18  ;;  %v245_v37 = vpack.c.bf16 %v165_v31, %v157_v30  ;;  %v394_v18 = vsub.s32 0, %v393_v17 }
  0xaa   :  { %1301 = vmatmul.mubr.bf16.vlgmr.msra.gmra.mxu0 %v202_v46  ;;  %v2303_v46 = vld [vmem:[#allocation8 + $0x68] sm:$0xff]  }
  0xab   :  { %1414 = vmatmul.mubr.bf16.vlgmr.msra.gmra.mxu1 %v204_v47  ;;  %1310 = vmatprep.mubr.bf16.mxu0 %v211_v48  ;;  %v2304_v47 = vld [vmem:[#allocation8 + $0x28] sm:$0xff]   ;;  %v242_v48 = vpack.c.bf16 %v162_v39, %v154_v38 }
  0xac   :  { %1423 = vmatprep.mubr.bf16.mxu1 %v213_v49  ;;  %2004 = vmatpush3.bf16.msra.mxu0 %v2300_v19  ;;  %v244_v49 = vpack.c.bf16 %v164_v41, %v156_v40  ;;  %v390_v19 = vld [vmem:[%s2691_s2] sm:$0x3] }
  0xad   :  { %2005 = vmatprep.subr.bf16.mxu0 %v2301_v32 }
  0xb0   :  { %2006 = vmatpush3.bf16.msra.mxu0 %v2302_v33 }
  0xb1   :  { %2007 = vmatprep.subr.bf16.mxu0 %v2303_v46 }
  0xb2   :  { %1311 = vmatmul.mubr.bf16.gmra.mxu0 %v210_v58  ;;  %v189_v58 = vld [vmem:[#allocation3 + $0x3b8] sm:$0xff] }
  0xb3   :  { %1424 = vmatmul.mubr.bf16.gmra.mxu1 %v212_v59  ;;  %1320 = vmatprep.mubr.bf16.mxu0 %v219_v60  ;;  %v197_v59 = vld [vmem:[#allocation3 + $0x3f8] sm:$0xff]  ;;  %v2305_v60 = vld [vmem:[#allocation8 + $0x60] sm:$0xff]  }
  0xb4   :  { %1433 = vmatprep.mubr.bf16.mxu1 %v221_v61  ;;  %2008 = vmatpush3.bf16.msra.mxu0 %v2304_v47  ;;  %v2306_v61 = vld [vmem:[#allocation8 + $0x20] sm:$0xff]   ;;  %v261_v1 = vpack.c.bf16 %v197_v59, %v189_v58 }
  0xb5   :  { %2009 = vmatprep.subr.bf16.mxu0 %v2305_v60 }
  0xb8   :  { %2010 = vmatpush3.bf16.msra.mxu0 %v2306_v61 }
  0xba   :  { %1321 = vmatmul.mubr.bf16.gmra.mxu0 %v218_v6  ;;  %v2307_v6 = vld [vmem:[#allocation8 + $0x58] sm:$0xff]  }
  0xbb   :  { %1434 = vmatmul.mubr.bf16.gmra.mxu1 %v220_v7  ;;  %1330 = vmatprep.mubr.bf16.mxu0 %v227_v8  ;;  %v2308_v7 = vld [vmem:[#allocation8 + $0x18] sm:$0xff]   ;;  %v258_v8 = vpack.c.bf16 %v194_v3, %v186_v2 }
  0xbc   :  { %1443 = vmatprep.mubr.bf16.mxu1 %v229_v9  ;;  %v260_v9 = vpack.c.bf16 %v196_v5, %v188_v4  ;;  %2011 = vmatprep.subr.bf16.mxu0 %v2307_v6 }
  0xbd   :  { %2012 = vmatpush3.bf16.msra.mxu0 %v2308_v7 }
  0xbe   :  { %2013 = vmatprep.subr.bf16.mxu0 %v2309_v10 }
  0xc1   :  { %2014 = vmatpush3.bf16.msra.mxu0 %v2310_v11 }
  0xc2   :  { %1331 = vmatmul.mubr.bf16.gmra.mxu0 %v226_v20  ;;  %2015 = vmatprep.subr.bf16.mxu0 %v2311_v12  ;;  %v398_v20 = vsub.s32 1, %v393_v17 }
  0xc3   :  { %1444 = vmatmul.mubr.bf16.gmra.mxu1 %v228_v21  ;;  %1340 = vmatprep.mubr.bf16.mxu0 %v235_v22  ;;  %v2464_v21 = vrot.slane %v390_v19, %v394_v18 }
  0xc4   :  { %1453 = vmatprep.mubr.bf16.mxu1 %v237_v23  ;;  %v2466_v22 = vrot.slane %v390_v19, %v398_v20 }
  0xc5   :  { %2016 = vmatpush3.bf16.msra.mxu0 %v2312_v13 }
  0xc6   :  { %2017 = vmatprep.subr.bf16.mxu0 %v2313_v14 }
  0xc9   :  { %2018 = vmatpush3.bf16.msra.mxu0 %v2314_v15 }
  0xca   :  { %1341 = vmatmul.mubr.bf16.gmra.mxu0 %v234_v34 }
  0xcb   :  { %1454 = vmatmul.mubr.bf16.gmra.mxu1 %v236_v35  ;;  %1350 = vmatprep.mubr.bf16.mxu0 %v243_v36 }
  0xcc   :  { %1463 = vmatprep.mubr.bf16.mxu1 %v245_v37 }
  0xd2   :  { %1351 = vmatmul.mubr.bf16.gmra.mxu0 %v242_v48 }
  0xd3   :  { %1464 = vmatmul.mubr.bf16.gmra.mxu1 %v244_v49  ;;  %1360 = vmatprep.mubr.bf16.mxu0 %v251_v50 }
  0xd4   :  { %1473 = vmatprep.mubr.bf16.mxu1 %v253_v51 }
  0xda   :  { %1361 = vmatmul.mubr.bf16.gmra.mxu0 %v250_v62 }
  0xdb   :  { %1474 = vmatmul.mubr.bf16.gmra.mxu1 %v252_v63  ;;  %1370 = vmatprep.mubr.bf16.mxu0 %v259_v0 }
  0xdc   :  { %1483 = vmatprep.mubr.bf16.mxu1 %v261_v1 }
  0xe2   :  { %1371 = vmatmul.mubr.bf16.gmra.mxu0 %v258_v8 }
  0xe3   :  { %1484 = vmatmul.mubr.bf16.gmra.mxu1 %v260_v9 }
 0x12a   :  { %v1076_v23 = vpop.f32.mrf.mxu0 }
 0x12b   :  { %v1189_v24 = vpop.f32.mrf.mxu1  ;;  %v1077_v25 = vadd.f32 %v1076_v23, %v2464_v21 }
 0x12c   :  { %v1078_v26 = vpop.f32.mrf.mxu0 }
 0x12d   :  { %v1191_v27 = vpop.f32.mrf.mxu1  ;;  %v2469_v28 = vadd.f32 %v1189_v24, %v1077_v25  ;;  %v1079_v29 = vadd.f32 %v1078_v26, %v2466_v22 }
 0x12e   :  { %v2472_v30 = vpop.f32.mrf.mxu0 }
 0x12f   :  { %v2474_v31 = vpop.f32.mrf.mxu1  ;;  %v2476_v32 = vadd.f32 %v1191_v27, %v1079_v29 }
 0x130   :  { %v2478_v33 = vpop.f32.mrf.mxu0 }
 0x131   :  { %v2480_v34 = vpop.f32.mrf.mxu1 }
 0x132   :  { %v1086_v35 = vpop.f32.mrf.mxu0 }
 0x133   :  { %v1199_v36 = vpop.f32.mrf.mxu1  ;;  %v1087_v37 = vadd.f32 %v1086_v35, %v2464_v21 }
 0x134   :  { %v1088_v38 = vpop.f32.mrf.mxu0 }
 0x135   :  { %v1201_v39 = vpop.f32.mrf.mxu1  ;;  %v2483_v40 = vadd.f32 %v1199_v36, %v1087_v37  ;;  %v1089_v41 = vadd.f32 %v1088_v38, %v2466_v22 }
 0x136   :  { %v2486_v42 = vpop.f32.mrf.mxu0 }
 0x137   :  { %v2488_v43 = vpop.f32.mrf.mxu1  ;;  %v2490_v44 = vadd.f32 %v1201_v39, %v1089_v41 }
 0x138   :  { %v2492_v45 = vpop.f32.mrf.mxu0 }
 0x139   :  { %v2494_v46 = vpop.f32.mrf.mxu1 }
 0x13a   :  { %v1096_v47 = vpop.f32.mrf.mxu0 }
 0x13b   :  { %v1209_v48 = vpop.f32.mrf.mxu1  ;;  %v1097_v49 = vadd.f32 %v1096_v47, %v2464_v21 }
 0x13c   :  { %v1098_v50 = vpop.f32.mrf.mxu0 }
 0x13d   :  { %v1211_v51 = vpop.f32.mrf.mxu1  ;;  %v2497_v52 = vadd.f32 %v1209_v48, %v1097_v49  ;;  %v1099_v53 = vadd.f32 %v1098_v50, %v2466_v22 }
 0x13e   :  { %v2500_v54 = vpop.f32.mrf.mxu0 }
 0x13f   :  { %v2502_v55 = vpop.f32.mrf.mxu1  ;;  %v2504_v56 = vadd.f32 %v1211_v51, %v1099_v53 }
 0x140   :  { %v2506_v57 = vpop.f32.mrf.mxu0 }
 0x141   :  { %v2508_v58 = vpop.f32.mrf.mxu1 }
 0x142   :  { %v1106_v59 = vpop.f32.mrf.mxu0 }
 0x143   :  { %v1219_v60 = vpop.f32.mrf.mxu1  ;;  %v1107_v61 = vadd.f32 %v1106_v59, %v2464_v21 }
 0x144   :  { %v1108_v62 = vpop.f32.mrf.mxu0 }
 0x145   :  { %v1221_v63 = vpop.f32.mrf.mxu1  ;;  %v2511_v0 = vadd.f32 %v1219_v60, %v1107_v61  ;;  %v1109_v1 = vadd.f32 %v1108_v62, %v2466_v22 }
 0x146   :  { %v2514_v2 = vpop.f32.mrf.mxu0 }
 0x147   :  { %v2516_v3 = vpop.f32.mrf.mxu1  ;;  %v2518_v4 = vadd.f32 %v1221_v63, %v1109_v1 }
 0x148   :  { %v2520_v5 = vpop.f32.mrf.mxu0 }
 0x149   :  { %v2522_v6 = vpop.f32.mrf.mxu1 }
 0x14a   :  { %v1116_v7 = vpop.f32.mrf.mxu0 }
 0x14b   :  { %v1229_v8 = vpop.f32.mrf.mxu1  ;;  %v1117_v9 = vadd.f32 %v1116_v7, %v2464_v21 }
 0x14c   :  { %v1118_v10 = vpop.f32.mrf.mxu0 }
 0x14d   :  { %v1231_v11 = vpop.f32.mrf.mxu1  ;;  %v2525_v12 = vadd.f32 %v1229_v8, %v1117_v9  ;;  %v1119_v13 = vadd.f32 %v1118_v10, %v2466_v22 }
 0x14e   :  { %v2528_v14 = vpop.f32.mrf.mxu0 }
 0x14f   :  { %v2530_v15 = vpop.f32.mrf.mxu1  ;;  %v2532_v16 = vadd.f32 %v1231_v11, %v1119_v13 }
 0x150   :  { %v2534_v17 = vpop.f32.mrf.mxu0 }
 0x151   :  { %v2536_v18 = vpop.f32.mrf.mxu1 }
 0x152   :  { %v1126_v19 = vpop.f32.mrf.mxu0 }
 0x153   :  { %v1239_v20 = vpop.f32.mrf.mxu1  ;;  %v1127_v23 = vadd.f32 %v1126_v19, %v2464_v21 }
 0x154   :  { %v1128_v24 = vpop.f32.mrf.mxu0 }
 0x155   :  { %v1241_v25 = vpop.f32.mrf.mxu1  ;;  %v2539_v26 = vadd.f32 %v1239_v20, %v1127_v23  ;;  %v1129_v27 = vadd.f32 %v1128_v24, %v2466_v22 }
 0x156   :  { %v2542_v29 = vpop.f32.mrf.mxu0 }
 0x157   :  { %v2544_v35 = vpop.f32.mrf.mxu1  ;;  %v2546_v36 = vadd.f32 %v1241_v25, %v1129_v27  ;;  %v1081_v25 = vadd.f32 %v2472_v30, %v2464_v21 }
 0x158   :  { %v2548_v37 = vpop.f32.mrf.mxu0 }
 0x159   :  { %v2550_v38 = vpop.f32.mrf.mxu1 }
 0x15a   :  { %v1136_v39 = vpop.f32.mrf.mxu0 }
 0x15b   :  { %v1249_v41 = vpop.f32.mrf.mxu1  ;;  %v1137_v47 = vadd.f32 %v1136_v39, %v2464_v21 }
 0x15c   :  { %v1138_v48 = vpop.f32.mrf.mxu0 }
 0x15d   :  { %v1251_v49 = vpop.f32.mrf.mxu1  ;;  %v2553_v50 = vadd.f32 %v1249_v41, %v1137_v47  ;;  %v1139_v51 = vadd.f32 %v1138_v48, %v2466_v22  ;;  %v1083_v41 = vadd.f32 %v2478_v33, %v2466_v22 }
 0x15e   :  { %v2556_v53 = vpop.f32.mrf.mxu0 }
 0x15f   :  { %v2558_v59 = vpop.f32.mrf.mxu1  ;;  %v2560_v60 = vadd.f32 %v1251_v49, %v1139_v51  ;;  %v1194_v49 = vadd.f32 %v2474_v31, %v1081_v25 }
 0x160   :  { %v2562_v61 = vpop.f32.mrf.mxu0 }
 0x161   :  { %v2564_v62 = vpop.f32.mrf.mxu1 }
 0x162   :  { %v1146_v63 = vpop.f32.mrf.mxu0 }
 0x163   :  { %v1259_v1 = vpop.f32.mrf.mxu1  ;;  %v1147_v7 = vadd.f32 %v1146_v63, %v2464_v21 }
 0x164   :  { %v1148_v8 = vpop.f32.mrf.mxu0 }
 0x165   :  { %v1261_v9 = vpop.f32.mrf.mxu1  ;;  %v2567_v10 = vadd.f32 %v1259_v1, %v1147_v7  ;;  %v1149_v11 = vadd.f32 %v1148_v8, %v2466_v22  ;;  %v1196_v8 = vadd.f32 %v2480_v34, %v1083_v41 }
 0x166   :  { %v2570_v13 = vpop.f32.mrf.mxu0 }
 0x167   :  { %2697 = vst [vmem:[#allocation13_spill] sm:$0xff] %v2567_v10  ;;  %v2572_v19 = vpop.f32.mrf.mxu1  ;;  %v2574_v20 = vadd.f32 %v1261_v9, %v1149_v11 }
 0x168   :  { %2698 = vst [vmem:[#allocation14_spill] sm:$0xff] %v2572_v19  ;;  %v2576_v23 = vpop.f32.mrf.mxu0 }
 0x169   :  { %2699 = vst [vmem:[#allocation15_spill] sm:$0xff] %v2574_v20  ;;  %2700 = vst [vmem:[#allocation16_spill] sm:$0xff] %v2576_v23  ;;  %v2578_v24 = vpop.f32.mrf.mxu1 }
 0x16a   :  { %2701 = vst [vmem:[#allocation17_spill] sm:$0xff] %v2578_v24  ;;  %v1302_v27 = vpop.f32.mrf.mxu0  ;;  %v1091_v24 = vadd.f32 %v2486_v42, %v2464_v21 }
 0x16b   :  { %v1415_v39 = vpop.f32.mrf.mxu1  ;;  %v1303_v63 = vadd.f32 %v1302_v27, %v2469_v28 }
 0x16c   :  { %v1304_v47 = vpop.f32.mrf.mxu0  ;;  %v1204_v34 = vadd.f32 %v2488_v43, %v1091_v24 }
 0x16d   :  { %v1417_v48 = vpop.f32.mrf.mxu1  ;;  %v1305_v51 = vadd.f32 %v1304_v47, %v2476_v32  ;;  %v1416_v19 = vadd.f32 %v1415_v39, %v1303_v63  ;;  %v1093_v32 = vadd.f32 %v2492_v45, %v2466_v22 }
 0x16e   :  { %v1306_v1 = vpop.f32.mrf.mxu0 }
 0x16f   :  { %v1419_v7 = vpop.f32.mrf.mxu1  ;;  %v1307_v9 = vadd.f32 %v1306_v1, %v1194_v49  ;;  %v1418_v10 = vadd.f32 %v1417_v48, %v1305_v51  ;;  %v1494_v42 = vmax.f32 %v1416_v19, 0.0  ;;  %v1206_v63 = vadd.f32 %v2494_v46, %v1093_v32 }
 0x170   :  { %v1308_v11 = vpop.f32.mrf.mxu0 }
 0x171   :  { %v1421_v30 = vpop.f32.mrf.mxu1  ;;  %v1420_v33 = vadd.f32 %v1419_v7, %v1307_v9  ;;  %v1309_v20 = vadd.f32 %v1308_v11, %v1196_v8  ;;  %v1495_v41 = vmax.f32 %v1418_v10, 0.0  ;;  %v1101_v11 = vadd.f32 %v2500_v54, %v2464_v21 }
 0x172   :  { %v1312_v23 = vpop.f32.mrf.mxu0 }
 0x173   :  { %v1425_v31 = vpop.f32.mrf.mxu1  ;;  %v1422_v28 = vadd.f32 %v1421_v30, %v1309_v20  ;;  %v1496_v25 = vmax.f32 %v1420_v33, 0.0  ;;  %v1313_v48 = vadd.f32 %v1312_v23, %v2483_v40  ;;  %v1103_v40 = vadd.f32 %v2506_v57, %v2466_v22 }
 0x174   :  { %v1314_v27 = vpop.f32.mrf.mxu0 }
 0x175   :  { %v1427_v47 = vpop.f32.mrf.mxu1  ;;  %v1497_v49 = vmax.f32 %v1422_v28, 0.0  ;;  %v1315_v1 = vadd.f32 %v1314_v27, %v2490_v44  ;;  %v1526_v45 = vpack.c.bf16 %v1496_v25, %v1494_v42  ;;  %v1426_v44 = vadd.f32 %v1425_v31, %v1313_v48 }
 0x176   :  { %v1316_v51 = vpop.f32.mrf.mxu0  ;;  %v1214_v28 = vadd.f32 %v2502_v55, %v1101_v11 }
 0x177   :  { %v1429_v39 = vpop.f32.mrf.mxu1  ;;  %v1527_v7 = vpack.c.bf16 %v1497_v49, %v1495_v41  ;;  %v1317_v8 = vadd.f32 %v1316_v51, %v1204_v34  ;;  %v1428_v43 = vadd.f32 %v1427_v47, %v1315_v1  ;;  %v1498_v47 = vmax.f32 %v1426_v44, 0.0 }
 0x178   :  { %v1318_v20 = vpop.f32.mrf.mxu0  ;;  %v1216_v49 = vadd.f32 %v2508_v58, %v1103_v40 }
 0x179   :  { %v1431_v9 = vpop.f32.mrf.mxu1  ;;  %v1430_v10 = vadd.f32 %v1429_v39, %v1317_v8  ;;  %v1319_v24 = vadd.f32 %v1318_v20, %v1206_v63  ;;  %1709 = vmatprep.mubr.bf16.mxu0 %v1527_v7  ;;  %v1499_v25 = vmax.f32 %v1428_v43, 0.0  ;;  %v1111_v39 = vadd.f32 %v2514_v2, %v2464_v21 }
 0x17a   :  { %v1322_v19 = vpop.f32.mrf.mxu0  ;;  %1710 = vmatmul.mubr.bf16.vlgmr.msra.gmra.mxu0 %v1526_v45 }
 0x17b   :  { %v1435_v30 = vpop.f32.mrf.mxu1  ;;  %v1432_v46 = vadd.f32 %v1431_v9, %v1319_v24  ;;  %v1500_v23 = vmax.f32 %v1430_v10, 0.0  ;;  %v1323_v34 = vadd.f32 %v1322_v19, %v2497_v52  ;;  %v1113_v52 = vadd.f32 %v2520_v5, %v2466_v22 }
 0x17c   :  { %v1324_v33 = vpop.f32.mrf.mxu0  ;;  %v1224_v43 = vadd.f32 %v2516_v3, %v1111_v39 }
 0x17d   :  { %v1437_v32 = vpop.f32.mrf.mxu1  ;;  %v1501_v27 = vmax.f32 %v1432_v46, 0.0  ;;  %v1325_v54 = vadd.f32 %v1324_v33, %v2504_v56  ;;  %v1528_v57 = vpack.c.bf16 %v1500_v23, %v1498_v47  ;;  %v1436_v56 = vadd.f32 %v1435_v30, %v1323_v34 }
 0x17e   :  { %v1326_v31 = vpop.f32.mrf.mxu0  ;;  %v1226_v46 = vadd.f32 %v2522_v6, %v1113_v52  ;;  %v1131_v52 = vadd.f32 %v2542_v29, %v2464_v21 }
 0x17f   :  { %v1439_v41 = vpop.f32.mrf.mxu1  ;;  %v1529_v1 = vpack.c.bf16 %v1501_v27, %v1499_v25  ;;  %v1327_v42 = vadd.f32 %v1326_v31, %v1214_v28  ;;  %v1438_v55 = vadd.f32 %v1437_v32, %v1325_v54  ;;  %v1502_v44 = vmax.f32 %v1436_v56, 0.0 }
 0x180   :  { %v1328_v48 = vpop.f32.mrf.mxu0  ;;  %v1121_v25 = vadd.f32 %v2528_v14, %v2464_v21 }
 0x181   :  { %v1441_v51 = vpop.f32.mrf.mxu1  ;;  %v1440_v63 = vadd.f32 %v1439_v41, %v1327_v42  ;;  %v1329_v7 = vadd.f32 %v1328_v48, %v1216_v49  ;;  %1717 = vmatprep.mubr.bf16.mxu0 %v1529_v1  ;;  %v1503_v10 = vmax.f32 %v1438_v55, 0.0 }
 0x182   :  { %v1332_v8 = vpop.f32.mrf.mxu0  ;;  %1718 = vmatmul.mubr.bf16.gmra.mxu0 %v1528_v57  ;;  %v1234_v1 = vadd.f32 %v2530_v15, %v1121_v25 }
 0x183   :  { %v1445_v45 = vpop.f32.mrf.mxu1  ;;  %v1442_v58 = vadd.f32 %v1441_v51, %v1329_v7  ;;  %v1504_v20 = vmax.f32 %v1440_v63, 0.0  ;;  %v1333_v19 = vadd.f32 %v1332_v8, %v2511_v0  ;;  %v1123_v0 = vadd.f32 %v2534_v17, %v2466_v22 }
 0x184   :  { %v1334_v9 = vpop.f32.mrf.mxu0 }
 0x185   :  { %v1447_v11 = vpop.f32.mrf.mxu1  ;;  %v1505_v24 = vmax.f32 %v1442_v58, 0.0  ;;  %v1335_v2 = vadd.f32 %v1334_v9, %v2518_v4  ;;  %v1530_v5 = vpack.c.bf16 %v1504_v20, %v1502_v44  ;;  %v1446_v4 = vadd.f32 %v1445_v45, %v1333_v19 }
 0x186   :  { %v1336_v30 = vpop.f32.mrf.mxu0  ;;  %v1236_v63 = vadd.f32 %v2536_v18, %v1123_v0 }
 0x187   :  { %v1449_v40 = vpop.f32.mrf.mxu1  ;;  %v1531_v23 = vpack.c.bf16 %v1505_v24, %v1503_v10  ;;  %v1337_v33 = vadd.f32 %v1336_v30, %v1224_v43  ;;  %v1448_v3 = vadd.f32 %v1447_v11, %v1335_v2  ;;  %v1506_v48 = vmax.f32 %v1446_v4, 0.0 }
 0x188   :  { %v1338_v32 = vpop.f32.mrf.mxu0  ;;  %v1244_v2 = vadd.f32 %v2544_v35, %v1131_v52 }
 0x189   :  { %v1451_v28 = vpop.f32.mrf.mxu1  ;;  %v1450_v27 = vadd.f32 %v1449_v40, %v1337_v33  ;;  %v1339_v54 = vadd.f32 %v1338_v32, %v1226_v46  ;;  %1725 = vmatprep.mubr.bf16.mxu0 %v1531_v23  ;;  %v1507_v42 = vmax.f32 %v1448_v3, 0.0  ;;  %v1141_v3 = vadd.f32 %v2556_v53, %v2464_v21 }
 0x18a   :  { %v1342_v47 = vpop.f32.mrf.mxu0  ;;  %1726 = vmatmul.mubr.bf16.gmra.mxu0 %v1530_v5 }
 0x18b   :  { %v1455_v34 = vpop.f32.mrf.mxu1  ;;  %v1452_v6 = vadd.f32 %v1451_v28, %v1339_v54  ;;  %v1508_v31 = vmax.f32 %v1450_v27, 0.0  ;;  %v1343_v51 = vadd.f32 %v1342_v47, %v2525_v12  ;;  %v1133_v12 = vadd.f32 %v2548_v37, %v2466_v22 }
 0x18c   :  { %v1344_v41 = vpop.f32.mrf.mxu0 }
 0x18d   :  { %v1457_v49 = vpop.f32.mrf.mxu1  ;;  %v1509_v57 = vmax.f32 %v1452_v6, 0.0  ;;  %v1345_v14 = vadd.f32 %v1344_v41, %v2532_v16  ;;  %v1532_v17 = vpack.c.bf16 %v1508_v31, %v1506_v48  ;;  %v1456_v16 = vadd.f32 %v1455_v34, %v1343_v51 }
 0x18e   :  { %v1346_v39 = vpop.f32.mrf.mxu0  ;;  %v1246_v33 = vadd.f32 %v2550_v38, %v1133_v12  ;;  %v1254_v31 = vadd.f32 %v2558_v59, %v1141_v3 }
 0x18f   :  { %v1459_v55 = vpop.f32.mrf.mxu1  ;;  %v1533_v7 = vpack.c.bf16 %v1509_v57, %v1507_v42  ;;  %v1347_v56 = vadd.f32 %v1346_v39, %v1234_v1  ;;  %v1458_v15 = vadd.f32 %v1457_v49, %v1345_v14  ;;  %v1510_v30 = vmax.f32 %v1456_v16, 0.0  ;;  %v2703_v16 = vld [vmem:[#allocation14_spill] sm:$0xff] }
 0x190   :  { %v1348_v8 = vpop.f32.mrf.mxu0 }
 0x191   :  { %v1461_v45 = vpop.f32.mrf.mxu1  ;;  %v1460_v58 = vadd.f32 %v1459_v55, %v1347_v56  ;;  %v1349_v20 = vadd.f32 %v1348_v8, %v1236_v63  ;;  %1733 = vmatprep.mubr.bf16.mxu0 %v1533_v7  ;;  %v1511_v44 = vmax.f32 %v1458_v15, 0.0  ;;  %v1151_v7 = vadd.f32 %v2570_v13, %v2464_v21  ;;  %v2704_v21 = vld [vmem:[#allocation15_spill] sm:$0xff] }
 0x192   :  { %v1352_v9 = vpop.f32.mrf.mxu0  ;;  %1734 = vmatmul.mubr.bf16.gmra.mxu0 %v1532_v17 }
 0x193   :  { %v1465_v11 = vpop.f32.mrf.mxu1  ;;  %v1462_v18 = vadd.f32 %v1461_v45, %v1349_v20  ;;  %v1512_v43 = vmax.f32 %v1460_v58, 0.0  ;;  %v1353_v40 = vadd.f32 %v1352_v9, %v2539_v26  ;;  %v1143_v26 = vadd.f32 %v2562_v61, %v2466_v22 }
 0x194   :  { %v1354_v10 = vpop.f32.mrf.mxu0  ;;  %v1264_v9 = vadd.f32 %v2703_v16, %v1151_v7 }
 0x195   :  { %v1467_v24 = vpop.f32.mrf.mxu1  ;;  %v1513_v19 = vmax.f32 %v1462_v18, 0.0  ;;  %v1355_v29 = vadd.f32 %v1354_v10, %v2546_v36  ;;  %v1534_v37 = vpack.c.bf16 %v1512_v43, %v1510_v30  ;;  %v1466_v36 = vadd.f32 %v1465_v11, %v1353_v40  ;;  %v2705_v43 = vld [vmem:[#allocation13_spill] sm:$0xff] }
 0x196   :  { %v1356_v46 = vpop.f32.mrf.mxu0  ;;  %v1256_v48 = vadd.f32 %v2564_v62, %v1143_v26 }
 0x197   :  { %v1469_v23 = vpop.f32.mrf.mxu1  ;;  %v1535_v5 = vpack.c.bf16 %v1513_v19, %v1511_v44  ;;  %v1357_v32 = vadd.f32 %v1356_v46, %v1244_v2  ;;  %v1468_v35 = vadd.f32 %v1467_v24, %v1355_v29  ;;  %v1514_v1 = vmax.f32 %v1466_v36, 0.0  ;;  %v2706_v44 = vld [vmem:[#allocation17_spill] sm:$0xff] }
 0x198   :  { %v1358_v28 = vpop.f32.mrf.mxu0  ;;  %v2409_v36 = vmov 0.0  }
 0x199   :  { %v1471_v25 = vpop.f32.mrf.mxu1  ;;  %v1470_v27 = vadd.f32 %v1469_v23, %v1357_v32  ;;  %v1359_v54 = vadd.f32 %v1358_v28, %v1246_v33  ;;  %1741 = vmatprep.mubr.bf16.mxu0 %v1535_v5  ;;  %v1515_v41 = vmax.f32 %v1468_v35, 0.0  ;;  %2076 = vmatprep.subr.bf16.mxu1 %v2409_v36 }
 0x19a   :  { %v1362_v4 = vpop.f32.mrf.mxu0  ;;  %1742 = vmatmul.mubr.bf16.gmra.mxu0 %v1534_v37  ;;  %2092 = vmatprep.mubr.msk.bf16.mxu1 %vm2410_vm0, %v2409_v36 }
 0x19b   :  { %v1475_v47 = vpop.f32.mrf.mxu1  ;;  %v1472_v38 = vadd.f32 %v1471_v25, %v1359_v54  ;;  %v1516_v34 = vmax.f32 %v1470_v27, 0.0  ;;  %v1363_v42 = vadd.f32 %v1362_v4, %v2553_v50  ;;  %v2702_v50 = vld [vmem:[#allocation16_spill] sm:$0xff] }
 0x19c   :  { %v1364_v0 = vpop.f32.mrf.mxu0  ;;  %v1153_v52 = vadd.f32 %v2702_v50, %v2466_v22 }
 0x19d   :  { %v1477_v6 = vpop.f32.mrf.mxu1  ;;  %v1517_v49 = vmax.f32 %v1472_v38, 0.0  ;;  %v1365_v53 = vadd.f32 %v1364_v0, %v2560_v60  ;;  %v1536_v61 = vpack.c.bf16 %v1516_v34, %v1514_v1  ;;  %v1476_v60 = vadd.f32 %v1475_v47, %v1363_v42  ;;  %v2649_v38 = vld [vmem:[%s2693_s4] ss:$0 sm:$0xff] }
 0x19e   :  { %v1366_v57 = vpop.f32.mrf.mxu0  ;;  %v1266_v19 = vadd.f32 %v2706_v44, %v1153_v52 }
 0x19f   :  { %v1479_v14 = vpop.f32.mrf.mxu1  ;;  %v1537_v51 = vpack.c.bf16 %v1517_v49, %v1515_v41  ;;  %v1367_v39 = vadd.f32 %v1366_v57, %v1254_v31  ;;  %v1478_v59 = vadd.f32 %v1477_v6, %v1365_v53  ;;  %v1518_v18 = vmax.f32 %v1476_v60, 0.0 }
 0x1a0   :  { %v1368_v55 = vpop.f32.mrf.mxu0 }
 0x1a1   :  { %v1481_v63 = vpop.f32.mrf.mxu1  ;;  %v1480_v56 = vadd.f32 %v1479_v14, %v1367_v39  ;;  %v1369_v17 = vadd.f32 %v1368_v55, %v1256_v48  ;;  %1749 = vmatprep.mubr.bf16.mxu0 %v1537_v51  ;;  %v1519_v11 = vmax.f32 %v1478_v59, 0.0 }
 0x1a2   :  { %v1372_v8 = vpop.f32.mrf.mxu0  ;;  %1750 = vmatmul.mubr.bf16.gmra.mxu0 %v1536_v61 }
 0x1a3   :  { %v1485_v45 = vpop.f32.mrf.mxu1  ;;  %v1482_v62 = vadd.f32 %v1481_v63, %v1369_v17  ;;  %v1520_v15 = vmax.f32 %v1480_v56, 0.0  ;;  %v1373_v10 = vadd.f32 %v1372_v8, %v2705_v43 }
 0x1a4   :  { %v1374_v58 = vpop.f32.mrf.mxu0 }
 0x1a5   :  { %v1487_v20 = vpop.f32.mrf.mxu1  ;;  %v1521_v12 = vmax.f32 %v1482_v62, 0.0  ;;  %v1375_v13 = vadd.f32 %v1374_v58, %v2704_v21  ;;  %v1538_v22 = vpack.c.bf16 %v1520_v15, %v1518_v18  ;;  %v1486_v5 = vadd.f32 %v1485_v45, %v1373_v10 }
 0x1a6   :  { %v1376_v24 = vpop.f32.mrf.mxu0 }
 0x1a7   :  { %v1489_v2 = vpop.f32.mrf.mxu1  ;;  %v1539_v29 = vpack.c.bf16 %v1521_v12, %v1519_v11  ;;  %v1377_v30 = vadd.f32 %v1376_v24, %v1264_v9  ;;  %v1488_v46 = vadd.f32 %v1487_v20, %v1375_v13  ;;  %v1522_v35 = vmax.f32 %v1486_v5, 0.0 }
 0x1a8   :  { %v1378_v40 = vpop.f32.mrf.mxu0 }
 0x1a9   :  { %v1490_v23 = vadd.f32 %v1489_v2, %v1377_v30  ;;  %v1379_v33 = vadd.f32 %v1378_v40, %v1266_v19  ;;  %1757 = vmatprep.mubr.bf16.mxu0 %v1539_v29  ;;  %v1491_v32 = vpop.f32.mrf.mxu1  ;;  %v1523_v25 = vmax.f32 %v1488_v46, 0.0 }
 0x1aa   :  { %1758 = vmatmul.mubr.bf16.gmra.mxu0 %v1538_v22 }
 0x1ab   :  { %v1492_v37 = vadd.f32 %v1491_v32, %v1379_v33  ;;  %v1524_v28 = vmax.f32 %v1490_v23, 0.0 }
 0x1ad   :  { %v1525_v3 = vmax.f32 %v1492_v37, 0.0  ;;  %v1540_v54 = vpack.c.bf16 %v1524_v28, %v1522_v35 }
 0x1af   :  { %v1541_v27 = vpack.c.bf16 %v1525_v3, %v1523_v25 }
 0x1b1   :  { %1765 = vmatprep.mubr.bf16.mxu0 %v1541_v27 }
 0x1b2   :  { %1766 = vmatmul.mubr.bf16.gmra.mxu0 %v1540_v54 }
 0x23a   :  { %v2019_v4 = vpop.f32.mrf.mxu0 }
 0x23c   :  { %v2020_v47 = vpop.f32.mrf.mxu0 }
 0x23d   :  { %v2021_v26 = vadd.f32 %v2020_v47, %v2019_v4 }
 0x23e   :  { %v2022_v34 = vpop.f32.mrf.mxu0 }
 0x23f   :  { %v1712_v6 = vadd.f32 %v2021_v26, %v2649_v38 }
 0x240   :  { %v2023_v0 = vpop.f32.mrf.mxu0 }
 0x241   :  { %v2024_v31 = vadd.f32 %v2023_v0, %v2022_v34  ;;  %v1774_v1 = vmax.f32 %v1712_v6, 0.0 }
 0x242   :  { %v2025_v41 = vpop.f32.mrf.mxu0 }
 0x243   :  { %v1715_v49 = vadd.f32 %v2024_v31, %v2649_v38 }
 0x244   :  { %v2026_v53 = vpop.f32.mrf.mxu0 }
 0x245   :  { %v1775_v42 = vmax.f32 %v1715_v49, 0.0  ;;  %v2027_v57 = vadd.f32 %v2026_v53, %v2025_v41 }
 0x246   :  { %v2028_v14 = vpop.f32.mrf.mxu0 }
 0x247   :  { %v2653_v48 = vpack.c.bf16 %v1775_v42, %v1774_v1  ;;  %v1720_v39 = vadd.f32 %v2027_v57, %v2649_v38 }
 0x248   :  { %v2029_v51 = vpop.f32.mrf.mxu0 }
 0x249   :  { %v2030_v61 = vadd.f32 %v2029_v51, %v2028_v14  ;;  %v1776_v59 = vmax.f32 %v1720_v39, 0.0 }
 0x24a   :  { %v2031_v55 = vpop.f32.mrf.mxu0 }
 0x24b   :  { %v1723_v63 = vadd.f32 %v2030_v61, %v2649_v38 }
 0x24c   :  { %v2032_v7 = vpop.f32.mrf.mxu0 }
 0x24d   :  { %v1777_v56 = vmax.f32 %v1723_v63, 0.0  ;;  %v2033_v17 = vadd.f32 %v2032_v7, %v2031_v55 }
 0x24e   :  { %v2034_v60 = vpop.f32.mrf.mxu0 }
 0x24f   :  { %v2657_v8 = vpack.c.bf16 %v1777_v56, %v1776_v59  ;;  %v1728_v50 = vadd.f32 %v2033_v17, %v2649_v38 }
 0x250   :  { %v2035_v45 = vpop.f32.mrf.mxu0 }
 0x251   :  { %v2036_v52 = vadd.f32 %v2035_v45, %v2034_v60  ;;  %v1778_v20 = vmax.f32 %v1728_v50, 0.0 }
 0x252   :  { %v2037_v62 = vpop.f32.mrf.mxu0 }
 0x253   :  { %v1731_v15 = vadd.f32 %v2036_v52, %v2649_v38  ;;  %v1800_v52 = vstv %s2695_s6 }
 0x254   :  { %v2038_v58 = vpop.f32.mrf.mxu0 }
 0x255   :  { %v1779_v16 = vmax.f32 %v1731_v15, 0.0  ;;  %v2039_v9 = vadd.f32 %v2038_v58, %v2037_v62 }
 0x256   :  { %v2040_v11 = vpop.f32.mrf.mxu0 }
 0x257   :  { %v1793_v12 = vpack.c.bf16 %v1779_v16, %v1778_v20  ;;  %v1736_v13 = vadd.f32 %v2039_v9, %v2649_v38 }
 0x258   :  { %v2041_v21 = vpop.f32.mrf.mxu0 }
 0x259   :  { %v2042_v18 = vadd.f32 %v2041_v21, %v2040_v11  ;;  %v1780_v2 = vmax.f32 %v1736_v13, 0.0 }
 0x25a   :  { %v2043_v43 = vpop.f32.mrf.mxu0 }
 0x25b   :  { %v1739_v10 = vadd.f32 %v2042_v18, %v2649_v38 }
 0x25c   :  { %v2044_v24 = vpop.f32.mrf.mxu0 }
 0x25d   :  { %v1781_v44 = vmax.f32 %v1739_v10, 0.0  ;;  %v2045_v63 = vadd.f32 %v2044_v24, %v2043_v43 }
 0x25e   :  { %v2046_v19 = vpop.f32.mrf.mxu0 }
 0x25f   :  { %v1794_v29 = vpack.c.bf16 %v1781_v44, %v1780_v2  ;;  %v1744_v17 = vadd.f32 %v2045_v63, %v2649_v38 }
 0x260   :  { %v2047_v30 = vpop.f32.mrf.mxu0 }
 0x261   :  { %v2048_v61 = vadd.f32 %v2047_v30, %v2046_v19  ;;  %v1782_v45 = vmax.f32 %v1744_v17, 0.0 }
 0x262   :  { %v2049_v22 = vpop.f32.mrf.mxu0 }
 0x263   :  { %v1747_v59 = vadd.f32 %v2048_v61, %v2649_v38 }
 0x264   :  { %v2050_v40 = vpop.f32.mrf.mxu0 }
 0x265   :  { %v2051_v42 = vadd.f32 %v2050_v40, %v2049_v22  ;;  %v1783_v60 = vmax.f32 %v1747_v59, 0.0 }
 0x266   :  { %v2052_v46 = vpop.f32.mrf.mxu0 }
 0x267   :  { %v1752_v39 = vadd.f32 %v2051_v42, %v2649_v38  ;;  %v1795_v50 = vpack.c.bf16 %v1783_v60, %v1782_v45 }
 0x268   :  { %v2053_v23 = vpop.f32.mrf.mxu0 }
 0x269   :  { %v2054_v53 = vadd.f32 %v2053_v23, %v2052_v46  ;;  %v1784_v7 = vmax.f32 %v1752_v39, 0.0 }
 0x26a   :  { %v2055_v33 = vpop.f32.mrf.mxu0 }
 0x26b   :  { %v1755_v14 = vadd.f32 %v2054_v53, %v2649_v38 }
 0x26c   :  { %v2056_v5 = vpop.f32.mrf.mxu0 }
 0x26d   :  { %v2057_v34 = vadd.f32 %v2056_v5, %v2055_v33  ;;  %v1785_v55 = vmax.f32 %v1755_v14, 0.0 }
 0x26e   :  { %v2058_v32 = vpop.f32.mrf.mxu0 }
 0x26f   :  { %v1760_v49 = vadd.f32 %v2057_v34, %v2649_v38  ;;  %v1796_v56 = vpack.c.bf16 %v1785_v55, %v1784_v7 }
 0x270   :  { %v2059_v37 = vpop.f32.mrf.mxu0 }
 0x271   :  { %v2060_v47 = vadd.f32 %v2059_v37, %v2058_v32  ;;  %v1786_v57 = vmax.f32 %v1760_v49, 0.0 }
 0x272   :  { %v2061_v28 = vpop.f32.mrf.mxu0 }
 0x273   :  { %v1763_v31 = vadd.f32 %v2060_v47, %v2649_v38 }
 0x274   :  { %v2062_v25 = vpop.f32.mrf.mxu0 }
 0x275   :  { %v2063_v3 = vadd.f32 %v2062_v25, %v2061_v28  ;;  %v1787_v1 = vmax.f32 %v1763_v31, 0.0 }
 0x276   :  { %v2064_v35 = vpop.f32.mrf.mxu0 }
 0x277   :  { %v1768_v54 = vadd.f32 %v2063_v3, %v2649_v38  ;;  %v1797_v51 = vpack.c.bf16 %v1787_v1, %v1786_v57 }
 0x278   :  { %v2065_v27 = vpop.f32.mrf.mxu0 }
 0x279   :  { %v2066_v4 = vadd.f32 %v2065_v27, %v2064_v35  ;;  %v1788_v0 = vmax.f32 %v1768_v54, 0.0 }
 0x27b   :  { %v1771_v26 = vadd.f32 %v2066_v4, %v2649_v38  ;;  %v1790_v38 = vld [vmem:[%s2694_s5] sm:$0x1] }
 0x27d   :  { %v1789_v6 = vmax.f32 %v1771_v26, 0.0 }
 0x27f   :  { %v1798_v41 = vpack.c.bf16 %v1789_v6, %v1788_v0 }
 0x281   :  { %2077 = vmatpush3.bf16.xpose.msra.mxu1 %v1798_v41 }
 0x282   :  { %2078 = vmatprep.subr.bf16.mxu1 %v2409_v36 }
 0x289   :  { %2079 = vmatpush3.bf16.xpose.msra.mxu1 %v1797_v51 }
 0x28a   :  { %2080 = vmatprep.subr.bf16.mxu1 %v2409_v36 }
 0x291   :  { %2081 = vmatpush3.bf16.xpose.msra.mxu1 %v1796_v56 }
 0x292   :  { %2082 = vmatprep.subr.bf16.mxu1 %v2409_v36 }
 0x299   :  { %2083 = vmatpush3.bf16.xpose.msra.mxu1 %v1795_v50 }
 0x29a   :  { %2084 = vmatprep.subr.bf16.mxu1 %v2409_v36 }
 0x2a1   :  { %2085 = vmatpush3.bf16.xpose.msra.mxu1 %v1794_v29 }
 0x2a2   :  { %2086 = vmatprep.subr.bf16.mxu1 %v2409_v36 }
 0x2a9   :  { %2087 = vmatpush3.bf16.xpose.msra.mxu1 %v1793_v12 }
 0x2aa   :  { %2088 = vmatprep.subr.bf16.mxu1 %v2409_v36 }
 0x2b1   :  { %2089 = vmatpush3.bf16.xpose.msra.mxu1 %v2657_v8 }
 0x2b2   :  { %2090 = vmatprep.subr.bf16.mxu1 %v2409_v36 }
 0x2b9   :  { %2091 = vmatpush3.bf16.xpose.msra.mxu1 %v2653_v48 }
 0x2c0   :  { %2093 = vmatmul.mubr.bf16.vlgmr.msra.gmra.mxu1 %v1790_v38 }
 0x380   :  { %v1835_v62 = vpop.f32.mrf.mxu1 }
 0x381   :  { %v1836_v15 = vadd.f32 %v1835_v62, %v1800_v52 }
 0x382   :  { %v2094_v58 = vpop.f32.mrf.mxu1 }
 0x383   :  { %1841 = vst [vmem:[#allocation9] sm:$0x1] %v1836_v15 }
 0x384   :  { %v1838_v8 = vpop.f32.mrf.mxu1 }
 0x385   :  { %2386 = shalt.err (!%p2383_p5)
}
 0x386   :  { %1851 = dma.vmem_to_hbm [thread:$0]  %s1849_s25, 16, %s2696_s7, [#allocation5]   ;;  %v2095_v36 = vpop.f32.mrf.mxu1 }
 0x387   :  { %2399 = dma.done.wait [#allocation5], 16  }
 0x388   :  { %2400 = vsyncadd [#allocation5], 4294967280 }
 0x389   :  { %1855 = vsyncpa [#allocation4], 1 }
 0x38a   :  { %1856 = vsyncpa [#allocation7], 1 }
 0x38b   :  { %1857 = vsyncpa [#allocation5], 1 }

</bundles_post_ra>
